<compile_context>
chip_gen: v5e
topology: v5e:2x2
jax: 0.10.0
libtpu: 0.0.40
codegen_flags: <defaults>
</compile_context>

<pallas_src>
import functools
import math

import jax
import jax.numpy as jnp
from jax import lax
from jax.experimental import pallas as pl
from jax.experimental.pallas import tpu as pltpu


_LN_EPS = 1e-12  # ESPnet LayerNorm eps


# ----------------------------------------------------------------------------
# Small helpers / device probes
# ----------------------------------------------------------------------------
def _round_up(x, m):
    return ((x + m - 1) // m) * m


@functools.lru_cache(maxsize=None)
def _vmem_capacity_bytes():
    try:
        return int(pltpu.get_tpu_info().vmem_capacity_bytes)
    except Exception:
        return 64 * 1024 * 1024  # conservative default (v7x per-TC VMEM)


@functools.lru_cache(maxsize=None)
def _single_buffer_supported():
    """Probe whether pipeline_mode=pl.Buffered(1) (single-buffered constants) works."""
    try:
        def k(x_ref, w_ref, o_ref):
            o_ref[...] = x_ref[...] + w_ref[...]

        x = jnp.arange(16 * 128, dtype=jnp.float32).reshape(16, 128)
        w = jnp.ones((1, 128), jnp.float32)
        out = pl.pallas_call(
            k,
            out_shape=jax.ShapeDtypeStruct((16, 128), jnp.float32),
            grid=(2,),
            in_specs=[pl.BlockSpec((8, 128), lambda i: (i, 0)),
                      pl.BlockSpec((1, 128), lambda i: (0, 0),
                                   pipeline_mode=pl.Buffered(1))],
            out_specs=pl.BlockSpec((8, 128), lambda i: (i, 0)),
        )(x, w)
        out = jax.block_until_ready(out)
        return bool(jnp.allclose(out, x + w))
    except Exception:
        return False


def _fixed_block_spec(shape):
    """Constant-index (weight/bias) block; single-buffered when supported."""
    if _single_buffer_supported():
        return pl.BlockSpec(shape, lambda *_: (0,) * len(shape),
                            pipeline_mode=pl.Buffered(1))
    return pl.BlockSpec(shape, lambda *_: (0,) * len(shape))


def _clamp_vmem(est):
    return int(min(_vmem_capacity_bytes(), max(32 * 1024 * 1024, int(est))))


def _pad_rows(x, mp):
    m = x.shape[0]
    if mp == m:
        return x
    return jnp.pad(x, ((0, mp - m), (0, 0)))


# ----------------------------------------------------------------------------
# Row-tiled driver (1-D grid over M = B*T rows, "parallel" semantics)
# ----------------------------------------------------------------------------
def _rows_pallas(kernel, out_cols, row_inputs, fixed_inputs, *,
                 out_dtype=jnp.float32, tile_cap=1024, extra_row_bytes=0):
    """Run `kernel(*row_refs, *fixed_refs, o_ref)` over row tiles of M rows.

    Row tile size is budget-aware (scaled by the per-row byte width so that
    double-buffered row tiles + kernel intermediates stay within a VMEM budget).
    """
    m = row_inputs[0].shape[0]
    io_row_bytes = sum(a.shape[1] * a.dtype.itemsize for a in row_inputs)
    io_row_bytes += out_cols * jnp.dtype(out_dtype).itemsize

    row_budget = max(2 * 1024 * 1024, _vmem_capacity_bytes() // 12)
    tm = max(8, min(tile_cap, row_budget // max(io_row_bytes + extra_row_bytes, 1)))
    tm = max(8, (tm // 8) * 8)                      # sublane aligned
    if m <= tm:
        tm = _round_up(m, 8)
        mp = tm
    else:
        mp = _round_up(m, tm)

    padded = [_pad_rows(a, mp) for a in row_inputs]
    in_specs = [pl.BlockSpec((tm, a.shape[1]), lambda i: (i, 0)) for a in padded]
    in_specs += [_fixed_block_spec(a.shape) for a in fixed_inputs]

    fixed_bytes = sum(a.size * a.dtype.itemsize for a in fixed_inputs)
    fixed_mult = 1 if _single_buffer_supported() else 2
    est = (2 * tm * io_row_bytes + tm * extra_row_bytes
           + fixed_mult * fixed_bytes + 4 * 1024 * 1024)

    out = pl.pallas_call(
        kernel,
        out_shape=jax.ShapeDtypeStruct((mp, out_cols), out_dtype),
        grid=(mp // tm,),
        in_specs=in_specs,
        out_specs=pl.BlockSpec((tm, out_cols), lambda i: (i, 0)),
        compiler_params=pltpu.CompilerParams(
            dimension_semantics=("parallel",),
            vmem_limit_bytes=_clamp_vmem(est)),
    )(*padded, *fixed_inputs)
    return out if mp == m else out[:m]


# ----------------------------------------------------------------------------
# Kernels
# ----------------------------------------------------------------------------
def _ln(x, g, b, eps):
    mean = jnp.mean(x, axis=-1, keepdims=True)
    var = jnp.mean((x - mean) ** 2, axis=-1, keepdims=True)
    return (x - mean) * lax.rsqrt(var + eps) * g + b


def _layernorm_kernel(x_ref, g_ref, b_ref, o_ref, *, eps):
    o_ref[...] = _ln(x_ref[...], g_ref[...], b_ref[...], eps)


def _ln_qkv_kernel(x_ref, g_ref, bb_ref, w_ref, b_ref, o_ref, *, eps):
    # fused LayerNorm1 + single (D, 3D) QKV projection; bf16 lane-dense output
    xn = _ln(x_ref[...], g_ref[...], bb_ref[...], eps)
    y = jnp.dot(xn.astype(jnp.bfloat16), w_ref[...],
                preferred_element_type=jnp.float32) + b_ref[...]
    o_ref[...] = y.astype(o_ref.dtype)


def _attnout_ln_ffn_kernel(ctx_ref, x_ref, wo_ref, bo_ref, g_ref, bb_ref,
                           w1_ref, b1_ref, w2_ref, b2_ref, o_ref, *, eps):
    # fused: attn-out projection + residual + LayerNorm2 + FFN1 + ReLU + FFN2 + residual
    y = jnp.dot(ctx_ref[...], wo_ref[...],
                preferred_element_type=jnp.float32) + bo_ref[...] + x_ref[...]
    xn = _ln(y, g_ref[...], bb_ref[...], eps)
    h = jnp.dot(xn.astype(jnp.bfloat16), w1_ref[...],
                preferred_element_type=jnp.float32) + b1_ref[...]
    h = jnp.maximum(h, 0.0)
    o_ref[...] = y + jnp.dot(h.astype(jnp.bfloat16), w2_ref[...],
                             preferred_element_type=jnp.float32) + b2_ref[...]


def _embed_pe_kernel(x_ref, pe_ref, w_ref, b_ref, o_ref, *, scale):
    # y = (x @ W + b) * sqrt(d_model) + positional encoding (PE is a fixed input)
    y = jnp.dot(x_ref[0], w_ref[...], preferred_element_type=jnp.float32) + b_ref[...]
    o_ref[0] = y * scale + pe_ref[...]


def _mha_kernel(q_ref, k_ref, v_ref, m_ref, o_ref, *, scale):
    # One (batch, head) pair per grid step; q/k/v tiles arrive per-head via DMA.
    # TODO(synk): for very long post-subsampling T, tile the kv axis flash-style
    # (online softmax) instead of materializing the full (T, T) score matrix.
    q = q_ref[0, 0]                      # (T, dk) bf16
    k = k_ref[0, 0]
    v = v_ref[0, 0]
    keep = m_ref[0] != 0.0               # (1, T) — broadcasts over query rows
    s = jnp.einsum('qd,kd->qk', q, k, preferred_element_type=jnp.float32) * scale
    s = jnp.where(keep, s, jnp.finfo(jnp.float32).min)
    s_max = jnp.max(s, axis=-1, keepdims=True)
    e = jnp.exp(s - s_max)
    p = e * pl.reciprocal(jnp.sum(e, axis=-1, keepdims=True), approx=True)
    p = jnp.where(keep, p, 0.0)          # ESPnet: attn.masked_fill(mask==0, 0.0)
    ctx = jnp.einsum('qk,kd->qd', p.astype(jnp.bfloat16), v,
                     preferred_element_type=jnp.float32)
    o_ref[0, 0] = ctx.astype(o_ref.dtype)


# ----------------------------------------------------------------------------
# Wrappers
# ----------------------------------------------------------------------------
def pallas_layernorm(x, gamma2, beta2, eps=_LN_EPS):
    d = x.shape[1]
    return _rows_pallas(functools.partial(_layernorm_kernel, eps=eps), d,
                        [x], [gamma2, beta2], tile_cap=1024)


def pallas_ln_qkv(x, gamma2, beta2, wqkv_bf, bqkv2, eps=_LN_EPS):
    n = wqkv_bf.shape[1]
    return _rows_pallas(functools.partial(_ln_qkv_kernel, eps=eps), n,
                        [x], [gamma2, beta2, wqkv_bf, bqkv2],
                        out_dtype=jnp.bfloat16, tile_cap=1024)


def pallas_attnout_ln_ffn(ctx_bf, x, wo_bf, bo2, gamma2, beta2,
                          w1_bf, b12, w2_bf, b22, eps=_LN_EPS):
    d = x.shape[1]
    f = w1_bf.shape[1]
    return _rows_pallas(functools.partial(_attnout_ln_ffn_kernel, eps=eps), d,
                        [ctx_bf, x],
                        [wo_bf, bo2, gamma2, beta2, w1_bf, b12, w2_bf, b22],
                        tile_cap=512, extra_row_bytes=f * 4)


def pallas_embed_posenc(x_btk_bf16, w_bf, b2, pe, d_model):
    """x: (B, T2, K) bf16; PE passed once as a fixed (T2, D) input (no broadcast)."""
    # TODO(synk): for very long post-subsampling T2, also tile the T axis here.
    B, T, K = x_btk_bf16.shape
    fixed_mult = 1 if _single_buffer_supported() else 2
    est = (2 * (T * K * 2 + T * d_model * 4)
           + fixed_mult * (T * d_model * 4 + K * d_model * 2 + d_model * 4)
           + 4 * 1024 * 1024)
    return pl.pallas_call(
        functools.partial(_embed_pe_kernel, scale=math.sqrt(d_model)),
        out_shape=jax.ShapeDtypeStruct((B, T, d_model), jnp.float32),
        grid=(B,),
        in_specs=[pl.BlockSpec((1, T, K), lambda b: (b, 0, 0)),
                  _fixed_block_spec(pe.shape),
                  _fixed_block_spec(w_bf.shape),
                  _fixed_block_spec(b2.shape)],
        out_specs=pl.BlockSpec((1, T, d_model), lambda b: (b, 0, 0)),
        compiler_params=pltpu.CompilerParams(
            dimension_semantics=("parallel",),
            vmem_limit_bytes=_clamp_vmem(est)),
    )(x_btk_bf16, pe, w_bf, b2)


def pallas_mha(q, k, v, mask_f):
    """q/k/v: (B, H, T, dk) bf16, mask_f: (B, 1, T) f32 -> ctx (B, H, T, dk) bf16."""
    B, H, T, dk = q.shape
    est = (2 * (3 * T * dk * 2 + T * dk * 2 + T * 4)
           + 8 * T * T * 4 + 4 * 1024 * 1024)
    return pl.pallas_call(
        functools.partial(_mha_kernel, scale=1.0 / math.sqrt(dk)),
        out_shape=jax.ShapeDtypeStruct((B, H, T, dk), jnp.bfloat16),
        grid=(B, H),
        in_specs=[pl.BlockSpec((1, 1, T, dk), lambda b, h: (b, h, 0, 0)),
                  pl.BlockSpec((1, 1, T, dk), lambda b, h: (b, h, 0, 0)),
                  pl.BlockSpec((1, 1, T, dk), lambda b, h: (b, h, 0, 0)),
                  pl.BlockSpec((1, 1, T), lambda b, h: (b, 0, 0))],
        out_specs=pl.BlockSpec((1, 1, T, dk), lambda b, h: (b, h, 0, 0)),
        compiler_params=pltpu.CompilerParams(
            dimension_semantics=("parallel", "parallel"),
            vmem_limit_bytes=_clamp_vmem(est)),
    )(q, k, v, mask_f)


# ----------------------------------------------------------------------------
# Glue (conv subsampling, PE table, parameter setup / prep)
# ----------------------------------------------------------------------------
def _conv2d_relu(x, w, b, stride=2):
    # Conv2dSubsampling conv (3x3, stride 2, VALID) + ReLU via XLA's native conv
    # (per review: im2col K=9 Pallas matmuls are lane-sparse; conv is a tiny FLOP share).
    y = lax.conv_general_dilated(x, w, window_strides=(stride, stride),
                                 padding='VALID',
                                 dimension_numbers=('NCHW', 'OIHW', 'NCHW'))
    return jnp.maximum(y + b.reshape(1, -1, 1, 1), 0.0)


def make_pe(T, D):
    pos = jnp.arange(T, dtype=jnp.float32)[:, None]
    div = jnp.exp(jnp.arange(0, D, 2, dtype=jnp.float32) * (-math.log(10000.0) / D))
    pe = jnp.zeros((T, D), jnp.float32)
    pe = pe.at[:, 0::2].set(jnp.sin(pos * div))
    pe = pe.at[:, 1::2].set(jnp.cos(pos * div))
    return pe                                       # (T, D)


def init_params(key, idim, d_model, n_heads, ffn_dim, num_blocks):
    def nrm(k, shape, scale=0.1):
        return scale * jax.random.normal(k, shape, jnp.float32)

    keys = iter(jax.random.split(key, 64))
    f2 = (((idim - 1) // 2) - 1) // 2
    p = {
        'conv1_w': nrm(next(keys), (d_model, 1, 3, 3)),
        'conv1_b': jnp.zeros((d_model,), jnp.float32),
        'conv2_w': nrm(next(keys), (d_model, d_model, 3, 3)),
        'conv2_b': jnp.zeros((d_model,), jnp.float32),
        'embed_w': nrm(next(keys), (d_model * f2, d_model)),
        'embed_b': jnp.zeros((d_model,), jnp.float32),
        'after_norm_g': jnp.ones((d_model,), jnp.float32),
        'after_norm_b': jnp.zeros((d_model,), jnp.float32),
        'layers': [],
    }
    for _ in range(num_blocks):
        lkeys = iter(jax.random.split(next(keys), 16))
        p['layers'].append({
            'norm1_g': jnp.ones((d_model,), jnp.float32),
            'norm1_b': jnp.zeros((d_model,), jnp.float32),
            'norm2_g': jnp.ones((d_model,), jnp.float32),
            'norm2_b': jnp.zeros((d_model,), jnp.float32),
            'wq': nrm(next(lkeys), (d_model, d_model)), 'bq': jnp.zeros((d_model,)),
            'wk': nrm(next(lkeys), (d_model, d_model)), 'bk': jnp.zeros((d_model,)),
            'wv': nrm(next(lkeys), (d_model, d_model)), 'bv': jnp.zeros((d_model,)),
            'wo': nrm(next(lkeys), (d_model, d_model)), 'bo': jnp.zeros((d_model,)),
            'wf1': nrm(next(lkeys), (d_model, ffn_dim)), 'bf1': jnp.zeros((ffn_dim,)),
            'wf2': nrm(next(lkeys), (ffn_dim, d_model)), 'bf2': jnp.zeros((d_model,)),
        })
    return p


def prepare_params(p):
    """One-time weight prep (fused QKV, bf16 casts, 2-D bias/gain reshapes),
    hoisted out of the forward pass per the perf review."""
    d = p['embed_w'].shape[1]
    out = {
        'conv1_w': p['conv1_w'], 'conv1_b': p['conv1_b'],
        'conv2_w': p['conv2_w'], 'conv2_b': p['conv2_b'],
        'embed_w': p['embed_w'].astype(jnp.bfloat16),
        'embed_b': p['embed_b'].reshape(1, d).astype(jnp.float32),
        'after_norm_g': p['after_norm_g'].reshape(1, d).astype(jnp.float32),
        'after_norm_b': p['after_norm_b'].reshape(1, d).astype(jnp.float32),
        'layers': [],
    }
    for lp in p['layers']:
        f = lp['wf1'].shape[1]
        out['layers'].append({
            'norm1_g': lp['norm1_g'].reshape(1, d).astype(jnp.float32),
            'norm1_b': lp['norm1_b'].reshape(1, d).astype(jnp.float32),
            'norm2_g': lp['norm2_g'].reshape(1, d).astype(jnp.float32),
            'norm2_b': lp['norm2_b'].reshape(1, d).astype(jnp.float32),
            'wqkv': jnp.concatenate([lp['wq'], lp['wk'], lp['wv']],
                                    axis=1).astype(jnp.bfloat16),
            'bqkv': jnp.concatenate([lp['bq'], lp['bk'], lp['bv']]
                                    ).reshape(1, 3 * d).astype(jnp.float32),
            'wo': lp['wo'].astype(jnp.bfloat16),
            'bo': lp['bo'].reshape(1, d).astype(jnp.float32),
            'wf1': lp['wf1'].astype(jnp.bfloat16),
            'bf1': lp['bf1'].reshape(1, f).astype(jnp.float32),
            'wf2': lp['wf2'].astype(jnp.bfloat16),
            'bf2': lp['bf2'].reshape(1, d).astype(jnp.float32),
        })
    return out


# ----------------------------------------------------------------------------
# Encoder forward (matches the torch module semantics in eval mode)
# ----------------------------------------------------------------------------
def encoder_forward(xs, masks, params, *, d_model, n_heads):
    B, T, idim = xs.shape
    H = n_heads
    dk = d_model // H

    # ---- Conv2dSubsampling: two 3x3/stride-2 convs (+ReLU) ----
    x = xs[:, None, :, :].astype(jnp.float32)                   # (B, 1, T, idim)
    h1 = _conv2d_relu(x, params['conv1_w'], params['conv1_b'])  # (B, C, T1, F1)
    h2 = _conv2d_relu(h1, params['conv2_w'], params['conv2_b'])  # (B, C, T2, F2)
    _, C, T2, F2 = h2.shape
    # (B, T2, C*F2) channel-major flatten (matches torch transpose(1,2).view), bf16 rows
    x_sub = h2.transpose(0, 2, 1, 3).reshape(B, T2, C * F2).astype(jnp.bfloat16)

    # ---- linear embed fused with PE scale+add (grid over batch, PE as fixed input) ----
    pe = make_pe(T2, d_model)
    x = pallas_embed_posenc(x_sub, params['embed_w'], params['embed_b'], pe, d_model)
    x = x.reshape(B * T2, d_model)                              # f32 residual stream

    # ---- mask subsampling (as in Conv2dSubsampling) ----
    masks_sub = masks[:, :, :-2:2][:, :, :-2:2]                 # (B, 1, T2)
    mask_f = masks_sub.astype(jnp.float32)                      # hoisted out of the loop

    # ---- encoder layers (pre-norm, MHA + FFN, residuals) ----
    for lp in params['layers']:
        # (1) fused LayerNorm1 + QKV projection -> (M, 3D) bf16
        qkv = pallas_ln_qkv(x, lp['norm1_g'], lp['norm1_b'], lp['wqkv'], lp['bqkv'])
        qkv = qkv.reshape(B, T2, 3, H, dk).transpose(2, 0, 3, 1, 4)  # (3, B, H, T2, dk)
        q, k, v = qkv[0], qkv[1], qkv[2]

        # (2) per-(batch, head) gridded attention -> (B, H, T2, dk) bf16
        ctx = pallas_mha(q, k, v, mask_f)
        ctx = ctx.transpose(0, 2, 1, 3).reshape(B * T2, d_model)     # (M, D) bf16

        # (3) fused out-proj + residual + LN2 + FFN1 + ReLU + FFN2 + residual
        x = pallas_attnout_ln_ffn(ctx, x, lp['wo'], lp['bo'],
                                  lp['norm2_g'], lp['norm2_b'],
                                  lp['wf1'], lp['bf1'], lp['wf2'], lp['bf2'])

    # ---- final LayerNorm (normalize_before=True) ----
    x = pallas_layernorm(x, params['after_norm_g'], params['after_norm_b'])
    return x.reshape(B, T2, d_model), masks_sub


# ----------------------------------------------------------------------------
if __name__ == "__main__":
    B, T, IDIM = 2, 16, 16
    D_MODEL, HEADS, FFN, BLOCKS = 32, 4, 64, 2

    key = jax.random.PRNGKey(0)
    k_x, k_p = jax.random.split(key)
    xs = jax.random.normal(k_x, (B, T, IDIM), jnp.float32)
    masks = jnp.ones((B, 1, T), dtype=bool)

    params = prepare_params(init_params(k_p, IDIM, D_MODEL, HEADS, FFN, BLOCKS))

    _single_buffer_supported()   # warm the Buffered(1) probe outside of jit tracing

    fwd = jax.jit(functools.partial(encoder_forward, d_model=D_MODEL, n_heads=HEADS))
    out, out_masks = fwd(xs, masks, params)
    out = jax.block_until_ready(out)
    out_masks = jax.block_until_ready(out_masks)

    assert out.shape == (B, 3, D_MODEL), out.shape
    assert out_masks.shape == (B, 1, 3), out_masks.shape
    assert bool(jnp.all(jnp.isfinite(out)))
    print("KERNEL_OK")
</pallas_src>

<mosaic_0001>
module attributes {stable_mosaic.version = 11 : i64} {
  func.func @k(%arg0: i32, %arg1: memref<8x128xf32, #tpu.memory_space<vmem>>, %arg2: memref<1x128xf32, #tpu.memory_space<vmem>>, %arg3: memref<8x128xf32, #tpu.memory_space<vmem>>) attributes {dimension_semantics = [#tpu.dimension_semantics<arbitrary>], iteration_bounds = array<i64: 2>, scalar_prefetch = 0 : i64, scratch_operands = 0 : i64, tpu.core_type = #tpu.core_type<tc>, window_params = [{transform_indices = @transform_0, window_bounds = array<i64: 8, 128>}, {pipeline_mode = #tpu.pipeline_mode<synchronous>, transform_indices = @transform_1, window_bounds = array<i64: 1, 128>}, {transform_indices = @transform_2, window_bounds = array<i64: 8, 128>}]} {
    %c0 = arith.constant 0 : index
    %c0_0 = arith.constant 0 : index
    %0 = vector.load %arg1[%c0, %c0_0] : memref<8x128xf32, #tpu.memory_space<vmem>>, vector<8x128xf32>
    %c0_1 = arith.constant 0 : index
    %c0_2 = arith.constant 0 : index
    %1 = vector.load %arg2[%c0_1, %c0_2] : memref<1x128xf32, #tpu.memory_space<vmem>>, vector<1x128xf32>
    %2 = vector.broadcast %1 : vector<1x128xf32> to vector<8x128xf32>
    %3 = arith.addf %0, %2 : vector<8x128xf32>
    %c0_3 = arith.constant 0 : index
    %c0_4 = arith.constant 0 : index
    %4 = vector.load %arg3[%c0_3, %c0_4] : memref<8x128xf32, #tpu.memory_space<vmem>>, vector<8x128xf32>
    tpu.vector_store %arg3[%c0_3, %c0_4], %3 {strides = array<i32>} : memref<8x128xf32, #tpu.memory_space<vmem>>, vector<8x128xf32>,
    return
  }
  func.func @transform_0(%arg0: i32) -> (i32, i32) {
    %c0_i32 = arith.constant 0 : i32
    %c0_i32_0 = arith.constant 0 : i32
    return %arg0, %c0_i32 : i32, i32
  }
  func.func @transform_1(%arg0: i32) -> (i32, i32) {
    %c0_i32 = arith.constant 0 : i32
    %c0_i32_0 = arith.constant 0 : i32
    %c0_i32_1 = arith.constant 0 : i32
    return %c0_i32, %c0_i32_0 : i32, i32
  }
  func.func @transform_2(%arg0: i32) -> (i32, i32) {
    %c0_i32 = arith.constant 0 : i32
    %c0_i32_0 = arith.constant 0 : i32
    return %arg0, %c0_i32 : i32, i32
  }
}

module attributes {stable_mosaic.version = 11 : i64} {
  func.func @_embed_pe_kernel(%arg0: i32, %arg1: memref<1x3x96xbf16, #tpu.memory_space<vmem>>, %arg2: memref<3x32xf32, #tpu.memory_space<vmem>>, %arg3: memref<96x32xbf16, #tpu.memory_space<vmem>>, %arg4: memref<1x32xf32, #tpu.memory_space<vmem>>, %arg5: memref<1x3x32xf32, #tpu.memory_space<vmem>>) attributes {dimension_semantics = [#tpu.dimension_semantics<parallel>], iteration_bounds = array<i64: 2>, scalar_prefetch = 0 : i64, scratch_operands = 0 : i64, tpu.core_type = #tpu.core_type<tc>, window_params = [{transform_indices = @transform_0, window_bounds = array<i64: 1, 3, 96>}, {pipeline_mode = #tpu.pipeline_mode<synchronous>, transform_indices = @transform_1, window_bounds = array<i64: 3, 32>}, {pipeline_mode = #tpu.pipeline_mode<synchronous>, transform_indices = @transform_2, window_bounds = array<i64: 96, 32>}, {pipeline_mode = #tpu.pipeline_mode<synchronous>, transform_indices = @transform_3, window_bounds = array<i64: 1, 32>}, {transform_indices = @transform_4, window_bounds = array<i64: 1, 3, 32>}]} {
    %c0 = arith.constant 0 : index
    %c0_0 = arith.constant 0 : index
    %c0_1 = arith.constant 0 : index
    %0 = vector.load %arg1[%c0, %c0_0, %c0_1] : memref<1x3x96xbf16, #tpu.memory_space<vmem>>, vector<1x3x96xbf16>
    %1 = vector.shape_cast %0 : vector<1x3x96xbf16> to vector<3x96xbf16>
    %c0_2 = arith.constant 0 : index
    %c0_3 = arith.constant 0 : index
    %2 = vector.load %arg3[%c0_2, %c0_3] : memref<96x32xbf16, #tpu.memory_space<vmem>>, vector<96x32xbf16>
    %cst = arith.constant dense<0.000000e+00> : vector<3x32xf32>
    %3 = tpu.matmul %1, %2, %cst {dimension_numbers = #tpu.dot_dimension_numbers<[1], [0], [0], [1], [0, 0, 1, 1], [], []>} : vector<3x96xbf16>, vector<96x32xbf16>, vector<3x32xf32> -> vector<3x32xf32>
    %c0_4 = arith.constant 0 : index
    %c0_5 = arith.constant 0 : index
    %4 = vector.load %arg4[%c0_4, %c0_5] : memref<1x32xf32, #tpu.memory_space<vmem>>, vector<1x32xf32>
    %5 = vector.broadcast %4 : vector<1x32xf32> to vector<3x32xf32>
    %6 = arith.addf %3, %5 : vector<3x32xf32>
    %cst_6 = arith.constant 5.65685415 : f32
    %7 = vector.broadcast %cst_6 : f32 to vector<3x32xf32>
    %8 = arith.mulf %6, %7 : vector<3x32xf32>
    %c0_7 = arith.constant 0 : index
    %c0_8 = arith.constant 0 : index
    %9 = vector.load %arg2[%c0_7, %c0_8] : memref<3x32xf32, #tpu.memory_space<vmem>>, vector<3x32xf32>
    %10 = arith.addf %8, %9 : vector<3x32xf32>
    %c0_9 = arith.constant 0 : index
    %c0_10 = arith.constant 0 : index
    %c0_11 = arith.constant 0 : index
    %11 = vector.load %arg5[%c0_9, %c0_10, %c0_11] : memref<1x3x32xf32, #tpu.memory_space<vmem>>, vector<1x3x32xf32>
    %12 = vector.shape_cast %11 : vector<1x3x32xf32> to vector<3x32xf32>
    %13 = vector.shape_cast %10 : vector<3x32xf32> to vector<1x3x32xf32>
    tpu.vector_store %arg5[%c0_9, %c0_10, %c0_11], %13 {strides = array<i32>} : memref<1x3x32xf32, #tpu.memory_space<vmem>>, vector<1x3x32xf32>,
    return
  }
  func.func @transform_0(%arg0: i32) -> (i32, i32, i32) {
    %c0_i32 = arith.constant 0 : i32
    %c0_i32_0 = arith.constant 0 : i32
    %c0_i32_1 = arith.constant 0 : i32
    return %arg0, %c0_i32, %c0_i32_0 : i32, i32, i32
  }
  func.func @transform_1(%arg0: i32) -> (i32, i32) {
    %c0_i32 = arith.constant 0 : i32
    %c0_i32_0 = arith.constant 0 : i32
    %c0_i32_1 = arith.constant 0 : i32
    return %c0_i32, %c0_i32_0 : i32, i32
  }
  func.func @transform_2(%arg0: i32) -> (i32, i32) {
    %c0_i32 = arith.constant 0 : i32
    %c0_i32_0 = arith.constant 0 : i32
    %c0_i32_1 = arith.constant 0 : i32
    return %c0_i32, %c0_i32_0 : i32, i32
  }
  func.func @transform_3(%arg0: i32) -> (i32, i32) {
    %c0_i32 = arith.constant 0 : i32
    %c0_i32_0 = arith.constant 0 : i32
    %c0_i32_1 = arith.constant 0 : i32
    return %c0_i32, %c0_i32_0 : i32, i32
  }
  func.func @transform_4(%arg0: i32) -> (i32, i32, i32) {
    %c0_i32 = arith.constant 0 : i32
    %c0_i32_0 = arith.constant 0 : i32
    %c0_i32_1 = arith.constant 0 : i32
    return %arg0, %c0_i32, %c0_i32_0 : i32, i32, i32
  }
}

module attributes {stable_mosaic.version = 11 : i64} {
  func.func @_ln_qkv_kernel(%arg0: i32, %arg1: memref<8x32xf32, #tpu.memory_space<vmem>>, %arg2: memref<1x32xf32, #tpu.memory_space<vmem>>, %arg3: memref<1x32xf32, #tpu.memory_space<vmem>>, %arg4: memref<32x96xbf16, #tpu.memory_space<vmem>>, %arg5: memref<1x96xf32, #tpu.memory_space<vmem>>, %arg6: memref<8x96xbf16, #tpu.memory_space<vmem>>) attributes {dimension_semantics = [#tpu.dimension_semantics<parallel>], iteration_bounds = array<i64: 1>, scalar_prefetch = 0 : i64, scratch_operands = 0 : i64, tpu.core_type = #tpu.core_type<tc>, window_params = [{transform_indices = @transform_0, window_bounds = array<i64: 8, 32>}, {pipeline_mode = #tpu.pipeline_mode<synchronous>, transform_indices = @transform_1, window_bounds = array<i64: 1, 32>}, {pipeline_mode = #tpu.pipeline_mode<synchronous>, transform_indices = @transform_2, window_bounds = array<i64: 1, 32>}, {pipeline_mode = #tpu.pipeline_mode<synchronous>, transform_indices = @transform_3, window_bounds = array<i64: 32, 96>}, {pipeline_mode = #tpu.pipeline_mode<synchronous>, transform_indices = @transform_4, window_bounds = array<i64: 1, 96>}, {transform_indices = @transform_5, window_bounds = array<i64: 8, 96>}]} {
    %c0 = arith.constant 0 : index
    %c0_0 = arith.constant 0 : index
    %0 = vector.load %arg1[%c0, %c0_0] : memref<8x32xf32, #tpu.memory_space<vmem>>, vector<8x32xf32>
    %c0_1 = arith.constant 0 : index
    %c0_2 = arith.constant 0 : index
    %1 = vector.load %arg2[%c0_1, %c0_2] : memref<1x32xf32, #tpu.memory_space<vmem>>, vector<1x32xf32>
    %c0_3 = arith.constant 0 : index
    %c0_4 = arith.constant 0 : index
    %2 = vector.load %arg3[%c0_3, %c0_4] : memref<1x32xf32, #tpu.memory_space<vmem>>, vector<1x32xf32>
    %cst = arith.constant dense<0.000000e+00> : vector<8xf32>
    %3 = vector.multi_reduction <add>, %0, %cst [1] : vector<8x32xf32> to vector<8xf32>
    %4 = vector.shape_cast %3 : vector<8xf32> to vector<8x1xf32>
    %cst_5 = arith.constant 3.200000e+01 : f32
    %5 = vector.broadcast %cst_5 : f32 to vector<8x1xf32>
    %6 = arith.divf %4, %5 : vector<8x1xf32>
    %7 = vector.broadcast %6 : vector<8x1xf32> to vector<8x32xf32>
    %8 = arith.subf %0, %7 : vector<8x32xf32>
    %9 = arith.mulf %8, %8 : vector<8x32xf32>
    %cst_6 = arith.constant dense<0.000000e+00> : vector<8xf32>
    %10 = vector.multi_reduction <add>, %9, %cst_6 [1] : vector<8x32xf32> to vector<8xf32>
    %11 = vector.shape_cast %10 : vector<8xf32> to vector<8x1xf32>
    %cst_7 = arith.constant 3.200000e+01 : f32
    %12 = vector.broadcast %cst_7 : f32 to vector<8x1xf32>
    %13 = arith.divf %11, %12 : vector<8x1xf32>
    %14 = vector.broadcast %6 : vector<8x1xf32> to vector<8x32xf32>
    %15 = arith.subf %0, %14 : vector<8x32xf32>
    %cst_8 = arith.constant 9.99999996E-13 : f32
    %16 = vector.broadcast %cst_8 : f32 to vector<8x1xf32>
    %17 = arith.addf %13, %16 : vector<8x1xf32>
    %18 = math.rsqrt %17 : vector<8x1xf32>
    %19 = vector.broadcast %18 : vector<8x1xf32> to vector<8x32xf32>
    %20 = arith.mulf %15, %19 : vector<8x32xf32>
    %21 = vector.broadcast %1 : vector<1x32xf32> to vector<8x32xf32>
    %22 = arith.mulf %20, %21 : vector<8x32xf32>
    %23 = vector.broadcast %2 : vector<1x32xf32> to vector<8x32xf32>
    %24 = arith.addf %22, %23 : vector<8x32xf32>
    %25 = arith.truncf %24 : vector<8x32xf32> to vector<8x32xbf16>
    %c0_9 = arith.constant 0 : index
    %c0_10 = arith.constant 0 : index
    %26 = vector.load %arg4[%c0_9, %c0_10] : memref<32x96xbf16, #tpu.memory_space<vmem>>, vector<32x96xbf16>
    %cst_11 = arith.constant dense<0.000000e+00> : vector<8x96xf32>
    %27 = tpu.matmul %25, %26, %cst_11 {dimension_numbers = #tpu.dot_dimension_numbers<[1], [0], [0], [1], [0, 0, 1, 1], [], []>} : vector<8x32xbf16>, vector<32x96xbf16>, vector<8x96xf32> -> vector<8x96xf32>
    %c0_12 = arith.constant 0 : index
    %c0_13 = arith.constant 0 : index
    %28 = vector.load %arg5[%c0_12, %c0_13] : memref<1x96xf32, #tpu.memory_space<vmem>>, vector<1x96xf32>
    %29 = vector.broadcast %28 : vector<1x96xf32> to vector<8x96xf32>
    %30 = arith.addf %27, %29 : vector<8x96xf32>
    %31 = arith.truncf %30 : vector<8x96xf32> to vector<8x96xbf16>
    %c0_14 = arith.constant 0 : index
    %c0_15 = arith.constant 0 : index
    %32 = vector.load %arg6[%c0_14, %c0_15] : memref<8x96xbf16, #tpu.memory_space<vmem>>, vector<8x96xbf16>
    tpu.vector_store %arg6[%c0_14, %c0_15], %31 {strides = array<i32>} : memref<8x96xbf16, #tpu.memory_space<vmem>>, vector<8x96xbf16>,
    return
  }
  func.func @transform_0(%arg0: i32) -> (i32, i32) {
    %c0_i32 = arith.constant 0 : i32
    %c0_i32_0 = arith.constant 0 : i32
    return %arg0, %c0_i32 : i32, i32
  }
  func.func @transform_1(%arg0: i32) -> (i32, i32) {
    %c0_i32 = arith.constant 0 : i32
    %c0_i32_0 = arith.constant 0 : i32
    %c0_i32_1 = arith.constant 0 : i32
    return %c0_i32, %c0_i32_0 : i32, i32
  }
  func.func @transform_2(%arg0: i32) -> (i32, i32) {
    %c0_i32 = arith.constant 0 : i32
    %c0_i32_0 = arith.constant 0 : i32
    %c0_i32_1 = arith.constant 0 : i32
    return %c0_i32, %c0_i32_0 : i32, i32
  }
  func.func @transform_3(%arg0: i32) -> (i32, i32) {
    %c0_i32 = arith.constant 0 : i32
    %c0_i32_0 = arith.constant 0 : i32
    %c0_i32_1 = arith.constant 0 : i32
    return %c0_i32, %c0_i32_0 : i32, i32
  }
  func.func @transform_4(%arg0: i32) -> (i32, i32) {
    %c0_i32 = arith.constant 0 : i32
    %c0_i32_0 = arith.constant 0 : i32
    %c0_i32_1 = arith.constant 0 : i32
    return %c0_i32, %c0_i32_0 : i32, i32
  }
  func.func @transform_5(%arg0: i32) -> (i32, i32) {
    %c0_i32 = arith.constant 0 : i32
    %c0_i32_0 = arith.constant 0 : i32
    return %arg0, %c0_i32 : i32, i32
  }
}

module attributes {stable_mosaic.version = 11 : i64} {
  func.func @_mha_kernel(%arg0: i32, %arg1: i32, %arg2: memref<1x1x3x8xbf16, #tpu.memory_space<vmem>>, %arg3: memref<1x1x3x8xbf16, #tpu.memory_space<vmem>>, %arg4: memref<1x1x3x8xbf16, #tpu.memory_space<vmem>>, %arg5: memref<1x1x3xf32, #tpu.memory_space<vmem>>, %arg6: memref<1x1x3x8xbf16, #tpu.memory_space<vmem>>) attributes {dimension_semantics = [#tpu.dimension_semantics<parallel>, #tpu.dimension_semantics<parallel>], iteration_bounds = array<i64: 2, 4>, scalar_prefetch = 0 : i64, scratch_operands = 0 : i64, tpu.core_type = #tpu.core_type<tc>, window_params = [{transform_indices = @transform_0, window_bounds = array<i64: 1, 1, 3, 8>}, {transform_indices = @transform_1, window_bounds = array<i64: 1, 1, 3, 8>}, {transform_indices = @transform_2, window_bounds = array<i64: 1, 1, 3, 8>}, {transform_indices = @transform_3, window_bounds = array<i64: 1, 1, 3>}, {transform_indices = @transform_4, window_bounds = array<i64: 1, 1, 3, 8>}]} {
    %c0 = arith.constant 0 : index
    %c0_0 = arith.constant 0 : index
    %c0_1 = arith.constant 0 : index
    %c0_2 = arith.constant 0 : index
    %0 = vector.load %arg2[%c0, %c0_0, %c0_1, %c0_2] : memref<1x1x3x8xbf16, #tpu.memory_space<vmem>>, vector<1x1x3x8xbf16>
    %1 = vector.shape_cast %0 : vector<1x1x3x8xbf16> to vector<3x8xbf16>
    %c0_3 = arith.constant 0 : index
    %c0_4 = arith.constant 0 : index
    %c0_5 = arith.constant 0 : index
    %c0_6 = arith.constant 0 : index
    %2 = vector.load %arg3[%c0_3, %c0_4, %c0_5, %c0_6] : memref<1x1x3x8xbf16, #tpu.memory_space<vmem>>, vector<1x1x3x8xbf16>
    %3 = vector.shape_cast %2 : vector<1x1x3x8xbf16> to vector<3x8xbf16>
    %c0_7 = arith.constant 0 : index
    %c0_8 = arith.constant 0 : index
    %c0_9 = arith.constant 0 : index
    %c0_10 = arith.constant 0 : index
    %4 = vector.load %arg4[%c0_7, %c0_8, %c0_9, %c0_10] : memref<1x1x3x8xbf16, #tpu.memory_space<vmem>>, vector<1x1x3x8xbf16>
    %5 = vector.shape_cast %4 : vector<1x1x3x8xbf16> to vector<3x8xbf16>
    %c0_11 = arith.constant 0 : index
    %c0_12 = arith.constant 0 : index
    %c0_13 = arith.constant 0 : index
    %6 = vector.load %arg5[%c0_11, %c0_12, %c0_13] : memref<1x1x3xf32, #tpu.memory_space<vmem>>, vector<1x1x3xf32>
    %7 = vector.shape_cast %6 : vector<1x1x3xf32> to vector<1x3xf32>
    %cst = arith.constant 0.000000e+00 : f32
    %8 = vector.broadcast %cst : f32 to vector<1x3xf32>
    %9 = arith.cmpf one, %7, %8 : vector<1x3xf32>
    "tpu.trace_start"() <{level = 10 : i32, message = "qd,kd->qk"}> : () -> ()
    %cst_14 = arith.constant dense<0.000000e+00> : vector<3x3xf32>
    %10 = tpu.matmul %1, %3, %cst_14 {dimension_numbers = #tpu.dot_dimension_numbers<[1], [1], [0], [0], [0, 0, 1, 0], [], []>} : vector<3x8xbf16>, vector<3x8xbf16>, vector<3x3xf32> -> vector<3x3xf32>
    "tpu.trace_stop"() : () -> ()
    %cst_15 = arith.constant 0.353553385 : f32
    %11 = vector.broadcast %cst_15 : f32 to vector<3x3xf32>
    %12 = arith.mulf %10, %11 : vector<3x3xf32>
    %cst_16 = arith.constant -3.40282347E+38 : f32
    %13 = vector.shape_cast %9 : vector<1x3xi1> to vector<1x3xi1>
    %14 = vector.broadcast %13 : vector<1x3xi1> to vector<3x3xi1>
    %15 = vector.broadcast %cst_16 : f32 to vector<3x3xf32>
    %16 = arith.select %14, %12, %15 : vector<3x3xi1>, vector<3x3xf32>
    %cst_17 = arith.constant dense<0xFF800000> : vector<3xf32>
    %17 = vector.multi_reduction <maximumf>, %16, %cst_17 [1] : vector<3x3xf32> to vector<3xf32>
    %18 = vector.shape_cast %17 : vector<3xf32> to vector<3x1xf32>
    %19 = vector.broadcast %18 : vector<3x1xf32> to vector<3x3xf32>
    %20 = arith.subf %16, %19 : vector<3x3xf32>
    %21 = math.exp %20 : vector<3x3xf32>
    %cst_18 = arith.constant dense<0.000000e+00> : vector<3xf32>
    %22 = vector.multi_reduction <add>, %21, %cst_18 [1] : vector<3x3xf32> to vector<3xf32>
    %23 = vector.shape_cast %22 : vector<3xf32> to vector<3x1xf32>
    %24 = tpu.reciprocal %23 {approx = true} : vector<3x1xf32> -> vector<3x1xf32>
    %25 = vector.broadcast %24 : vector<3x1xf32> to vector<3x3xf32>
    %26 = arith.mulf %21, %25 : vector<3x3xf32>
    %cst_19 = arith.constant 0.000000e+00 : f32
    %27 = vector.shape_cast %9 : vector<1x3xi1> to vector<1x3xi1>
    %28 = vector.broadcast %27 : vector<1x3xi1> to vector<3x3xi1>
    %29 = vector.broadcast %cst_19 : f32 to vector<3x3xf32>
    %30 = arith.select %28, %26, %29 : vector<3x3xi1>, vector<3x3xf32>
    %31 = arith.truncf %30 : vector<3x3xf32> to vector<3x3xbf16>
    "tpu.trace_start"() <{level = 10 : i32, message = "qk,kd->qd"}> : () -> ()
    %cst_20 = arith.constant dense<0.000000e+00> : vector<3x8xf32>
    %32 = tpu.matmul %31, %5, %cst_20 {dimension_numbers = #tpu.dot_dimension_numbers<[1], [0], [0], [1], [0, 0, 1, 1], [], []>} : vector<3x3xbf16>, vector<3x8xbf16>, vector<3x8xf32> -> vector<3x8xf32>
    "tpu.trace_stop"() : () -> ()
    %33 = arith.truncf %32 : vector<3x8xf32> to vector<3x8xbf16>
    %c0_21 = arith.constant 0 : index
    %c0_22 = arith.constant 0 : index
    %c0_23 = arith.constant 0 : index
    %c0_24 = arith.constant 0 : index
    %34 = vector.load %arg6[%c0_21, %c0_22, %c0_23, %c0_24] : memref<1x1x3x8xbf16, #tpu.memory_space<vmem>>, vector<1x1x3x8xbf16>
    %35 = vector.shape_cast %34 : vector<1x1x3x8xbf16> to vector<3x8xbf16>
    %36 = vector.shape_cast %33 : vector<3x8xbf16> to vector<1x1x3x8xbf16>
    tpu.vector_store %arg6[%c0_21, %c0_22, %c0_23, %c0_24], %36 {strides = array<i32>} : memref<1x1x3x8xbf16, #tpu.memory_space<vmem>>, vector<1x1x3x8xbf16>,
    return
  }
  func.func @transform_0(%arg0: i32, %arg1: i32) -> (i32, i32, i32, i32) {
    %c0_i32 = arith.constant 0 : i32
    %c0_i32_0 = arith.constant 0 : i32
    %c0_i32_1 = arith.constant 0 : i32
    return %arg0, %arg1, %c0_i32, %c0_i32_0 : i32, i32, i32, i32
  }
  func.func @transform_1(%arg0: i32, %arg1: i32) -> (i32, i32, i32, i32) {
    %c0_i32 = arith.constant 0 : i32
    %c0_i32_0 = arith.constant 0 : i32
    %c0_i32_1 = arith.constant 0 : i32
    return %arg0, %arg1, %c0_i32, %c0_i32_0 : i32, i32, i32, i32
  }
  func.func @transform_2(%arg0: i32, %arg1: i32) -> (i32, i32, i32, i32) {
    %c0_i32 = arith.constant 0 : i32
    %c0_i32_0 = arith.constant 0 : i32
    %c0_i32_1 = arith.constant 0 : i32
    return %arg0, %arg1, %c0_i32, %c0_i32_0 : i32, i32, i32, i32
  }
  func.func @transform_3(%arg0: i32, %arg1: i32) -> (i32, i32, i32) {
    %c0_i32 = arith.constant 0 : i32
    %c0_i32_0 = arith.constant 0 : i32
    %c0_i32_1 = arith.constant 0 : i32
    return %arg0, %c0_i32, %c0_i32_0 : i32, i32, i32
  }
  func.func @transform_4(%arg0: i32, %arg1: i32) -> (i32, i32, i32, i32) {
    %c0_i32 = arith.constant 0 : i32
    %c0_i32_0 = arith.constant 0 : i32
    %c0_i32_1 = arith.constant 0 : i32
    return %arg0, %arg1, %c0_i32, %c0_i32_0 : i32, i32, i32, i32
  }
}

module attributes {stable_mosaic.version = 11 : i64} {
  func.func @_layernorm_kernel(%arg0: i32, %arg1: memref<8x32xf32, #tpu.memory_space<vmem>>, %arg2: memref<1x32xf32, #tpu.memory_space<vmem>>, %arg3: memref<1x32xf32, #tpu.memory_space<vmem>>, %arg4: memref<8x32xf32, #tpu.memory_space<vmem>>) attributes {dimension_semantics = [#tpu.dimension_semantics<parallel>], iteration_bounds = array<i64: 1>, scalar_prefetch = 0 : i64, scratch_operands = 0 : i64, tpu.core_type = #tpu.core_type<tc>, window_params = [{transform_indices = @transform_0, window_bounds = array<i64: 8, 32>}, {pipeline_mode = #tpu.pipeline_mode<synchronous>, transform_indices = @transform_1, window_bounds = array<i64: 1, 32>}, {pipeline_mode = #tpu.pipeline_mode<synchronous>, transform_indices = @transform_2, window_bounds = array<i64: 1, 32>}, {transform_indices = @transform_3, window_bounds = array<i64: 8, 32>}]} {
    %c0 = arith.constant 0 : index
    %c0_0 = arith.constant 0 : index
    %0 = vector.load %arg1[%c0, %c0_0] : memref<8x32xf32, #tpu.memory_space<vmem>>, vector<8x32xf32>
    %c0_1 = arith.constant 0 : index
    %c0_2 = arith.constant 0 : index
    %1 = vector.load %arg2[%c0_1, %c0_2] : memref<1x32xf32, #tpu.memory_space<vmem>>, vector<1x32xf32>
    %c0_3 = arith.constant 0 : index
    %c0_4 = arith.constant 0 : index
    %2 = vector.load %arg3[%c0_3, %c0_4] : memref<1x32xf32, #tpu.memory_space<vmem>>, vector<1x32xf32>
    %cst = arith.constant dense<0.000000e+00> : vector<8xf32>
    %3 = vector.multi_reduction <add>, %0, %cst [1] : vector<8x32xf32> to vector<8xf32>
    %4 = vector.shape_cast %3 : vector<8xf32> to vector<8x1xf32>
    %cst_5 = arith.constant 3.200000e+01 : f32
    %5 = vector.broadcast %cst_5 : f32 to vector<8x1xf32>
    %6 = arith.divf %4, %5 : vector<8x1xf32>
    %7 = vector.broadcast %6 : vector<8x1xf32> to vector<8x32xf32>
    %8 = arith.subf %0, %7 : vector<8x32xf32>
    %9 = arith.mulf %8, %8 : vector<8x32xf32>
    %cst_6 = arith.constant dense<0.000000e+00> : vector<8xf32>
    %10 = vector.multi_reduction <add>, %9, %cst_6 [1] : vector<8x32xf32> to vector<8xf32>
    %11 = vector.shape_cast %10 : vector<8xf32> to vector<8x1xf32>
    %cst_7 = arith.constant 3.200000e+01 : f32
    %12 = vector.broadcast %cst_7 : f32 to vector<8x1xf32>
    %13 = arith.divf %11, %12 : vector<8x1xf32>
    %14 = vector.broadcast %6 : vector<8x1xf32> to vector<8x32xf32>
    %15 = arith.subf %0, %14 : vector<8x32xf32>
    %cst_8 = arith.constant 9.99999996E-13 : f32
    %16 = vector.broadcast %cst_8 : f32 to vector<8x1xf32>
    %17 = arith.addf %13, %16 : vector<8x1xf32>
    %18 = math.rsqrt %17 : vector<8x1xf32>
    %19 = vector.broadcast %18 : vector<8x1xf32> to vector<8x32xf32>
    %20 = arith.mulf %15, %19 : vector<8x32xf32>
    %21 = vector.broadcast %1 : vector<1x32xf32> to vector<8x32xf32>
    %22 = arith.mulf %20, %21 : vector<8x32xf32>
    %23 = vector.broadcast %2 : vector<1x32xf32> to vector<8x32xf32>
    %24 = arith.addf %22, %23 : vector<8x32xf32>
    %c0_9 = arith.constant 0 : index
    %c0_10 = arith.constant 0 : index
    %25 = vector.load %arg4[%c0_9, %c0_10] : memref<8x32xf32, #tpu.memory_space<vmem>>, vector<8x32xf32>
    tpu.vector_store %arg4[%c0_9, %c0_10], %24 {strides = array<i32>} : memref<8x32xf32, #tpu.memory_space<vmem>>, vector<8x32xf32>,
    return
  }
  func.func @transform_0(%arg0: i32) -> (i32, i32) {
    %c0_i32 = arith.constant 0 : i32
    %c0_i32_0 = arith.constant 0 : i32
    return %arg0, %c0_i32 : i32, i32
  }
  func.func @transform_1(%arg0: i32) -> (i32, i32) {
    %c0_i32 = arith.constant 0 : i32
    %c0_i32_0 = arith.constant 0 : i32
    %c0_i32_1 = arith.constant 0 : i32
    return %c0_i32, %c0_i32_0 : i32, i32
  }
  func.func @transform_2(%arg0: i32) -> (i32, i32) {
    %c0_i32 = arith.constant 0 : i32
    %c0_i32_0 = arith.constant 0 : i32
    %c0_i32_1 = arith.constant 0 : i32
    return %c0_i32, %c0_i32_0 : i32, i32
  }
  func.func @transform_3(%arg0: i32) -> (i32, i32) {
    %c0_i32 = arith.constant 0 : i32
    %c0_i32_0 = arith.constant 0 : i32
    return %arg0, %c0_i32 : i32, i32
  }
}

module attributes {stable_mosaic.version = 11 : i64} {
  func.func @_attnout_ln_ffn_kernel(%arg0: i32, %arg1: memref<8x32xbf16, #tpu.memory_space<vmem>>, %arg2: memref<8x32xf32, #tpu.memory_space<vmem>>, %arg3: memref<32x32xbf16, #tpu.memory_space<vmem>>, %arg4: memref<1x32xf32, #tpu.memory_space<vmem>>, %arg5: memref<1x32xf32, #tpu.memory_space<vmem>>, %arg6: memref<1x32xf32, #tpu.memory_space<vmem>>, %arg7: memref<32x64xbf16, #tpu.memory_space<vmem>>, %arg8: memref<1x64xf32, #tpu.memory_space<vmem>>, %arg9: memref<64x32xbf16, #tpu.memory_space<vmem>>, %arg10: memref<1x32xf32, #tpu.memory_space<vmem>>, %arg11: memref<8x32xf32, #tpu.memory_space<vmem>>) attributes {dimension_semantics = [#tpu.dimension_semantics<parallel>], iteration_bounds = array<i64: 1>, scalar_prefetch = 0 : i64, scratch_operands = 0 : i64, tpu.core_type = #tpu.core_type<tc>, window_params = [{transform_indices = @transform_0, window_bounds = array<i64: 8, 32>}, {transform_indices = @transform_1, window_bounds = array<i64: 8, 32>}, {pipeline_mode = #tpu.pipeline_mode<synchronous>, transform_indices = @transform_2, window_bounds = array<i64: 32, 32>}, {pipeline_mode = #tpu.pipeline_mode<synchronous>, transform_indices = @transform_3, window_bounds = array<i64: 1, 32>}, {pipeline_mode = #tpu.pipeline_mode<synchronous>, transform_indices = @transform_4, window_bounds = array<i64: 1, 32>}, {pipeline_mode = #tpu.pipeline_mode<synchronous>, transform_indices = @transform_5, window_bounds = array<i64: 1, 32>}, {pipeline_mode = #tpu.pipeline_mode<synchronous>, transform_indices = @transform_6, window_bounds = array<i64: 32, 64>}, {pipeline_mode = #tpu.pipeline_mode<synchronous>, transform_indices = @transform_7, window_bounds = array<i64: 1, 64>}, {pipeline_mode = #tpu.pipeline_mode<synchronous>, transform_indices = @transform_8, window_bounds = array<i64: 64, 32>}, {pipeline_mode = #tpu.pipeline_mode<synchronous>, transform_indices = @transform_9, window_bounds = array<i64: 1, 32>}, {transform_indices = @transform_10, window_bounds = array<i64: 8, 32>}]} {
    %c0 = arith.constant 0 : index
    %c0_0 = arith.constant 0 : index
    %0 = vector.load %arg1[%c0, %c0_0] : memref<8x32xbf16, #tpu.memory_space<vmem>>, vector<8x32xbf16>
    %c0_1 = arith.constant 0 : index
    %c0_2 = arith.constant 0 : index
    %1 = vector.load %arg3[%c0_1, %c0_2] : memref<32x32xbf16, #tpu.memory_space<vmem>>, vector<32x32xbf16>
    %cst = arith.constant dense<0.000000e+00> : vector<8x32xf32>
    %2 = tpu.matmul %0, %1, %cst {dimension_numbers = #tpu.dot_dimension_numbers<[1], [0], [0], [1], [0, 0, 1, 1], [], []>} : vector<8x32xbf16>, vector<32x32xbf16>, vector<8x32xf32> -> vector<8x32xf32>
    %c0_3 = arith.constant 0 : index
    %c0_4 = arith.constant 0 : index
    %3 = vector.load %arg4[%c0_3, %c0_4] : memref<1x32xf32, #tpu.memory_space<vmem>>, vector<1x32xf32>
    %4 = vector.broadcast %3 : vector<1x32xf32> to vector<8x32xf32>
    %5 = arith.addf %2, %4 : vector<8x32xf32>
    %c0_5 = arith.constant 0 : index
    %c0_6 = arith.constant 0 : index
    %6 = vector.load %arg2[%c0_5, %c0_6] : memref<8x32xf32, #tpu.memory_space<vmem>>, vector<8x32xf32>
    %7 = arith.addf %5, %6 : vector<8x32xf32>
    %c0_7 = arith.constant 0 : index
    %c0_8 = arith.constant 0 : index
    %8 = vector.load %arg5[%c0_7, %c0_8] : memref<1x32xf32, #tpu.memory_space<vmem>>, vector<1x32xf32>
    %c0_9 = arith.constant 0 : index
    %c0_10 = arith.constant 0 : index
    %9 = vector.load %arg6[%c0_9, %c0_10] : memref<1x32xf32, #tpu.memory_space<vmem>>, vector<1x32xf32>
    %cst_11 = arith.constant dense<0.000000e+00> : vector<8xf32>
    %10 = vector.multi_reduction <add>, %7, %cst_11 [1] : vector<8x32xf32> to vector<8xf32>
    %11 = vector.shape_cast %10 : vector<8xf32> to vector<8x1xf32>
    %cst_12 = arith.constant 3.200000e+01 : f32
    %12 = vector.broadcast %cst_12 : f32 to vector<8x1xf32>
    %13 = arith.divf %11, %12 : vector<8x1xf32>
    %14 = vector.broadcast %13 : vector<8x1xf32> to vector<8x32xf32>
    %15 = arith.subf %7, %14 : vector<8x32xf32>
    %16 = arith.mulf %15, %15 : vector<8x32xf32>
    %cst_13 = arith.constant dense<0.000000e+00> : vector<8xf32>
    %17 = vector.multi_reduction <add>, %16, %cst_13 [1] : vector<8x32xf32> to vector<8xf32>
    %18 = vector.shape_cast %17 : vector<8xf32> to vector<8x1xf32>
    %cst_14 = arith.constant 3.200000e+01 : f32
    %19 = vector.broadcast %cst_14 : f32 to vector<8x1xf32>
    %20 = arith.divf %18, %19 : vector<8x1xf32>
    %21 = vector.broadcast %13 : vector<8x1xf32> to vector<8x32xf32>
    %22 = arith.subf %7, %21 : vector<8x32xf32>
    %cst_15 = arith.constant 9.99999996E-13 : f32
    %23 = vector.broadcast %cst_15 : f32 to vector<8x1xf32>
    %24 = arith.addf %20, %23 : vector<8x1xf32>
    %25 = math.rsqrt %24 : vector<8x1xf32>
    %26 = vector.broadcast %25 : vector<8x1xf32> to vector<8x32xf32>
    %27 = arith.mulf %22, %26 : vector<8x32xf32>
    %28 = vector.broadcast %8 : vector<1x32xf32> to vector<8x32xf32>
    %29 = arith.mulf %27, %28 : vector<8x32xf32>
    %30 = vector.broadcast %9 : vector<1x32xf32> to vector<8x32xf32>
    %31 = arith.addf %29, %30 : vector<8x32xf32>
    %32 = arith.truncf %31 : vector<8x32xf32> to vector<8x32xbf16>
    %c0_16 = arith.constant 0 : index
    %c0_17 = arith.constant 0 : index
    %33 = vector.load %arg7[%c0_16, %c0_17] : memref<32x64xbf16, #tpu.memory_space<vmem>>, vector<32x64xbf16>
    %cst_18 = arith.constant dense<0.000000e+00> : vector<8x64xf32>
    %34 = tpu.matmul %32, %33, %cst_18 {dimension_numbers = #tpu.dot_dimension_numbers<[1], [0], [0], [1], [0, 0, 1, 1], [], []>} : vector<8x32xbf16>, vector<32x64xbf16>, vector<8x64xf32> -> vector<8x64xf32>
    %c0_19 = arith.constant 0 : index
    %c0_20 = arith.constant 0 : index
    %35 = vector.load %arg8[%c0_19, %c0_20] : memref<1x64xf32, #tpu.memory_space<vmem>>, vector<1x64xf32>
    %36 = vector.broadcast %35 : vector<1x64xf32> to vector<8x64xf32>
    %37 = arith.addf %34, %36 : vector<8x64xf32>
    %cst_21 = arith.constant 0.000000e+00 : f32
    %38 = vector.broadcast %cst_21 : f32 to vector<8x64xf32>
    %39 = arith.maximumf %37, %38 : vector<8x64xf32>
    %40 = arith.truncf %39 : vector<8x64xf32> to vector<8x64xbf16>
    %c0_22 = arith.constant 0 : index
    %c0_23 = arith.constant 0 : index
    %41 = vector.load %arg9[%c0_22, %c0_23] : memref<64x32xbf16, #tpu.memory_space<vmem>>, vector<64x32xbf16>
    %cst_24 = arith.constant dense<0.000000e+00> : vector<8x32xf32>
    %42 = tpu.matmul %40, %41, %cst_24 {dimension_numbers = #tpu.dot_dimension_numbers<[1], [0], [0], [1], [0, 0, 1, 1], [], []>} : vector<8x64xbf16>, vector<64x32xbf16>, vector<8x32xf32> -> vector<8x32xf32>
    %43 = arith.addf %7, %42 : vector<8x32xf32>
    %c0_25 = arith.constant 0 : index
    %c0_26 = arith.constant 0 : index
    %44 = vector.load %arg10[%c0_25, %c0_26] : memref<1x32xf32, #tpu.memory_space<vmem>>, vector<1x32xf32>
    %45 = vector.broadcast %44 : vector<1x32xf32> to vector<8x32xf32>
    %46 = arith.addf %43, %45 : vector<8x32xf32>
    %c0_27 = arith.constant 0 : index
    %c0_28 = arith.constant 0 : index
    %47 = vector.load %arg11[%c0_27, %c0_28] : memref<8x32xf32, #tpu.memory_space<vmem>>, vector<8x32xf32>
    tpu.vector_store %arg11[%c0_27, %c0_28], %46 {strides = array<i32>} : memref<8x32xf32, #tpu.memory_space<vmem>>, vector<8x32xf32>,
    return
  }
  func.func @transform_0(%arg0: i32) -> (i32, i32) {
    %c0_i32 = arith.constant 0 : i32
    %c0_i32_0 = arith.constant 0 : i32
    return %arg0, %c0_i32 : i32, i32
  }
  func.func @transform_1(%arg0: i32) -> (i32, i32) {
    %c0_i32 = arith.constant 0 : i32
    %c0_i32_0 = arith.constant 0 : i32
    return %arg0, %c0_i32 : i32, i32
  }
  func.func @transform_2(%arg0: i32) -> (i32, i32) {
    %c0_i32 = arith.constant 0 : i32
    %c0_i32_0 = arith.constant 0 : i32
    %c0_i32_1 = arith.constant 0 : i32
    return %c0_i32, %c0_i32_0 : i32, i32
  }
  func.func @transform_3(%arg0: i32) -> (i32, i32) {
    %c0_i32 = arith.constant 0 : i32
    %c0_i32_0 = arith.constant 0 : i32
    %c0_i32_1 = arith.constant 0 : i32
    return %c0_i32, %c0_i32_0 : i32, i32
  }
  func.func @transform_4(%arg0: i32) -> (i32, i32) {
    %c0_i32 = arith.constant 0 : i32
    %c0_i32_0 = arith.constant 0 : i32
    %c0_i32_1 = arith.constant 0 : i32
    return %c0_i32, %c0_i32_0 : i32, i32
  }
  func.func @transform_5(%arg0: i32) -> (i32, i32) {
    %c0_i32 = arith.constant 0 : i32
    %c0_i32_0 = arith.constant 0 : i32
    %c0_i32_1 = arith.constant 0 : i32
    return %c0_i32, %c0_i32_0 : i32, i32
  }
  func.func @transform_6(%arg0: i32) -> (i32, i32) {
    %c0_i32 = arith.constant 0 : i32
    %c0_i32_0 = arith.constant 0 : i32
    %c0_i32_1 = arith.constant 0 : i32
    return %c0_i32, %c0_i32_0 : i32, i32
  }
  func.func @transform_7(%arg0: i32) -> (i32, i32) {
    %c0_i32 = arith.constant 0 : i32
    %c0_i32_0 = arith.constant 0 : i32
    %c0_i32_1 = arith.constant 0 : i32
    return %c0_i32, %c0_i32_0 : i32, i32
  }
  func.func @transform_8(%arg0: i32) -> (i32, i32) {
    %c0_i32 = arith.constant 0 : i32
    %c0_i32_0 = arith.constant 0 : i32
    %c0_i32_1 = arith.constant 0 : i32
    return %c0_i32, %c0_i32_0 : i32, i32
  }
  func.func @transform_9(%arg0: i32) -> (i32, i32) {
    %c0_i32 = arith.constant 0 : i32
    %c0_i32_0 = arith.constant 0 : i32
    %c0_i32_1 = arith.constant 0 : i32
    return %c0_i32, %c0_i32_0 : i32, i32
  }
  func.func @transform_10(%arg0: i32) -> (i32, i32) {
    %c0_i32 = arith.constant 0 : i32
    %c0_i32_0 = arith.constant 0 : i32
    return %arg0, %c0_i32 : i32, i32
  }
}

</mosaic_0001>

<bundles_post_ra>
// kernel: tpu_custom_call.1
= control target key start
LH: loop header
LB: loop body
LE: loop exit
PB: predicated region body
PF: predicated region fallthrough
CT: control target
= control target key end

     0   :  { %7 = vsyncpa [#allocation3], 0  ;;  %s637_s0 = inlined_call_operand.hbm [shape: f32[16,128], index: 0, kind: input, shape index: {}]   ;;  %s638_s1 = inlined_call_operand.hbm [shape: f32[1,128], index: 1, kind: input, shape index: {}]   ;;  %s639_s2 = inlined_call_operand.hbm [shape: f32[16,128], index: 2, kind: output, shape index: {}]  }
   0x1   :  { %9 = vsyncpa [#allocation3 + $0x1], 0 }
   0x2   :  { %10 = vsyncpa [#allocation6], 0 }
   0x3   :  { %11 = vsyncpa [#allocation4], 0 }
   0x4   :  { %13 = vsyncpa [#allocation4 + $0x1], 0  ;;  %s499_s9 = smov 0   ;;  %s501_s10 = smov 0  }
   0x5   :  { %s503_s11 = smov 0   ;;  %s505_s12 = smov 0  }
   0x6 LB: > { %s520_s13 = sadd.s32 4294967295, %s481_s12   ;;  %s279_s14 = sadd.s32 4294967294, %s481_s12   ;;  %s481_s12 = sphi %s505_s12, %s649_s12   ;;  %s477_s11 = sphi %s503_s11, %s648_s11   ;;  %s473_s10 = sphi %s501_s10, %s647_s10   ;;  %s469_s9 = sphi %s499_s9, %s646_s9  }
   0x7   : > { %p39_p0 = scmp.ne.s32.totalorder %s473_s10, %s469_s9  ;;  %p40_p1 = scmp.eq.s32.totalorder %s520_s13, 0 }
   0x8   : > { %p84_p2 = scmp.eq.s32.totalorder %s520_s13, 1  ;;  %p90_p3 = scmp.eq.s32.totalorder %s279_s14, 1 }
   0x9   : > { %p529_p4 = por %p40_p1, %p39_p0  ;;  %p280_p5 = scmp.ge.s32.totalorder %s481_s12, 1 }
   0xa   : > { %p534_p6 = por %p90_p3, %p39_p0  ;;  %p97_p7 = scmp.lt.s32.totalorder %s481_s12, 3 }
   0xb   : > { %s109_s19 = sshll.u32 %s638_s1, 4  ;;  %s483_s21 = smov [#allocation5]   ;;  %s110_s19 = int_to_ptr.hbm [resolvable:$true] %s109_s19 }
   0xc   : > { %p542_p8 = pnand %p280_p5, %p97_p7  ;;  %s111_s22 = sshll.u32 %s483_s21, 4  ;;  %s112_s22 = int_to_ptr.vmem [resolvable:$true] %s111_s22 }
   0xd   : > { %s552_s23 = sadd.s32 1, %s481_s12   ;;  %s26_s24 = sadd.s32 1, %s477_s11 }
   0xe   : > { %p301_p10 = pneg %p542_p8  ;;  %s23_s25 = ssub.s32 %s481_s12, %s552_s23 }
   0xf   : > { %p24_p12 = scmp.eq.s32.totalorder %s23_s25, 0  ;;  %p33_p13 = scmp.ne.s32.totalorder %s477_s11, %s473_s10 }
  0x10   : > { %p302_p11 = pnand %p301_p10, %p40_p1  ;;  %p34_p0 = scmp.eq.s32.totalorder %s481_s12, 0 }
  0x11   : > { %s561_s26 = scalar_select %p24_p12, %s477_s11, %s26_s24  }
  0x12   : > { %304 = dma.hbm_to_vmem [thread:$0]  (!%p302_p11), %s110_s19, 16, %s112_s22, [#allocation6]  }
  0x13   : > { %p565_p3 = por %p84_p2, %p33_p13  ;;  %p314_p5 = scmp.lt.s32.totalorder %s481_s12, 2 }
  0x14   : > { %s122_s28 = sand.u32 1, %s477_s11   ;;  %s284_s29 = sshll.u32 %s481_s12, 3 }
  0x15   : > { %p35_p7 = por %p34_p0, %p33_p13  ;;  %s283_s30 = sshll.u32 %s122_s28, 3 }
  0x16   : > { %s130_s5 = scalar_lea.hbm %s637_s0, %s284_s29  ;;  %s126_s7 = scalar_lea.vmem [#allocation2], %s283_s30 }
  0x17   : > { %s132_s6 = sshll.u32 %s130_s5, 4  ;;  %s134_s8 = sshll.u32 %s126_s7, 4  ;;  %s133_s6 = int_to_ptr.hbm [resolvable:$true] %s132_s6  ;;  %s135_s8 = int_to_ptr.vmem [resolvable:$true] %s134_s8 }
  0x18   : > { %p575_p10 = pnand %p314_p5, %p35_p7  ;;  %s123_s17 = scalar_lea.sflag [#allocation3], %s122_s28 }
  0x19   : > { %s381_s18 = sshra.s32 %s133_s6, 4  ;;  %s388_s24 = scalar_lea.hbm %s637_s0, 16  ;;  %s382_s18 = int_to_ptr.hbm [resolvable:$true] %s381_s18 }
  0x1a   : > { %s383_s19 = scalar_lea.hbm %s382_s18, 8  ;;  %p385_p11 = pneg %p575_p10 }
  0x1b   : > { %p384_p2 = scmp.ne.s32.totalorder %s382_s18, %s383_s19  ;;  %p389_p0 = scmp.lt.s32.totalorder %s382_s18, %s637_s0 }
  0x1c   : > { %p390_p5 = scmp.lt.s32.totalorder %s388_s24, %s383_s19 }
  0x1d   : > { %p386_p12 = pnand %p385_p11, %p384_p2 }
  0x1e   : > { %p391_p7 = por %p390_p5, %p389_p0 }
  0x1f   : > { %p387_p13 = pneg %p386_p12 }
  0x21   : > { %p392_p9 = pnand %p391_p7, %p387_p13 }
  0x23   : > { %395 = shalt.err (!%p392_p9)
}
  0x24   : > { %308 = dma.hbm_to_vmem [thread:$0]  (!%p575_p10), %s133_s6, 128, %s135_s8, %s123_s17  }
  0x25   : > { %143 = sbr.rel (%p542_p8) target bundleno = 60 (0x3c), region = 28  ;;  %s592_s28 = sand.u32 (!%p542_p8), 1, %s473_s10  }
  0x26   : > { %s286_s30 = sshll.u32 (!%p542_p8), %s592_s28, 3  ;;  %s146_s3 = scalar_lea.sflag (!%p542_p8), [#allocation3], %s592_s28 }
  0x27   : > { %s149_s4 = scalar_lea.vmem (!%p542_p8), [#allocation2], %s286_s30 }
  0x2a   : > { %456 = dma.done.wait (%p529_p4), %s146_s3, 128  }
  0x2b   : > { %458 = vsyncadd (%p529_p4), %s146_s3, 4294967168 }
  0x2c   : > { %460 = dma.done.wait (%p40_p1), [#allocation6], 16  }
  0x2d   : > { %462 = vsyncadd (%p40_p1), [#allocation6], 4294967280  ;;  %s290_s20 = sshll.u32 %s520_s13, 3  ;;  %s175_s8 = scalar_lea.vmem [#allocation7], %s286_s30  ;;  %v176_v0 = vld [vmem:[%s149_s4] sm:$0xff] }
  0x2e   : > { %s194_s7 = scalar_lea.hbm %s639_s2, %s290_s20  ;;  %s196_s14 = sshll.u32 %s175_s8, 4  ;;  %v350_v1 = vld [vmem:[#allocation5] ss:$0 sm:$0xff]  ;;  %s197_s14 = int_to_ptr.vmem [resolvable:$true] %s196_s14 }
  0x2f   : > { %s198_s17 = sshll.u32 %s194_s7, 4  ;;  %v181_v2 = vadd.f32 %v350_v1, %v176_v0  ;;  %s184_s15 = scalar_lea.sflag [#allocation4], %s592_s28  ;;  %s199_s17 = int_to_ptr.hbm [resolvable:$true] %s198_s17 }
  0x30   : > { %s425_s18 = sshra.s32 %s199_s17, 4  ;;  %s431_s22 = scalar_lea.hbm %s639_s2, 16  ;;  %s426_s18 = int_to_ptr.hbm [resolvable:$true] %s425_s18 }
  0x31   : > { %182 = vst [vmem:[%s175_s8] sm:$0xff] %v181_v2  ;;  %s427_s19 = scalar_lea.hbm %s426_s18, 8  ;;  %p432_p9 = scmp.lt.s32.totalorder %s426_s18, %s639_s2 }
  0x32   : > { %p428_p1 = scmp.ne.s32.totalorder %s426_s18, %s427_s19  ;;  %p433_p10 = scmp.lt.s32.totalorder %s431_s22, %s427_s19 }
  0x34   : > { %p429_p4 = pnand %p428_p1, %p565_p3  ;;  %p434_p2 = por %p433_p10, %p432_p9 }
  0x36   : > { %p430_p8 = pneg %p429_p4 }
  0x38   : > { %p435_p11 = pnand %p434_p2, %p430_p8 }
  0x3a   : > { %438 = shalt.err (!%p435_p11)
}
  0x3b   : > { %299 = dma.vmem_to_hbm [thread:$0]  (%p565_p3), %s197_s14, 128, %s199_s17, %s184_s15  }
  0x3c PF: > { %s210_s29 = sand.u32 1, %s469_s9   ;;  %p645_p12 = scmp.ge.s32.totalorder %s481_s12, 2 }
  0x3d   : > { %s211_s28 = scalar_lea.sflag [#allocation4], %s210_s29 }
  0x3e   : > { %p310_p13 = pnand %p645_p12, %p534_p6 }
  0x40   : > { %p311_p0 = pneg %p310_p13 }
  0x42   : > { %464 = dma.done.wait (%p311_p0), %s211_s28, 128  }
  0x43   : > { %466 = vsyncadd (%p311_p0), %s211_s28, 4294967168  ;;  %p16_p5 = scmp.ge.s32.totalorder %s552_s23, 4   ;;  %s646_s9 = smov %s473_s10 }
  0x44   : > { %s647_s10 = smov %s477_s11  ;;  %s648_s11 = smov %s561_s26 }
  0x45   : > { %s649_s12 = smov %s552_s23  ;;  %18 = sbr.rel (!%p16_p5) target bundleno = 6 (0x6), region = 77 }
  0x4a   :  { %217 = vsyncpa [#allocation3], 1 }
  0x4b   :  { %219 = vsyncpa [#allocation3 + $0x1], 1 }
  0x4c   :  { %220 = vsyncpa [#allocation6], 1 }
  0x4d   :  { %221 = vsyncpa [#allocation4], 1 }
  0x4e   :  { %223 = vsyncpa [#allocation4 + $0x1], 1 }

// kernel: encoder_forward.8
= control target key start
LH: loop header
LB: loop body
LE: loop exit
PB: predicated region body
PF: predicated region fallthrough
CT: control target
= control target key end

     0   :  { %s404_s15 = smov 0   ;;  %s445_s0 = inlined_call_operand.vmem [shape: bf16[2,3,96], index: 0, kind: input, shape index: {}]   ;;  %s446_s1 = inlined_call_operand.vmem [shape: f32[3,32], index: 1, kind: input, shape index: {}]   ;;  %s447_s2 = inlined_call_operand.vmem [shape: bf16[96,32], index: 2, kind: input, shape index: {}]   ;;  %s448_s3 = inlined_call_operand.vmem [shape: f32[1,32], index: 3, kind: input, shape index: {}]   ;;  %s449_s4 = inlined_call_operand.vmem [shape: f32[2,3,32], index: 4, kind: output, shape index: {}]  }
   0x1 LB: > { %s322_s16 = sadd.s32 4294967295, %s377_s15   ;;  %p326_p0 = scmp.ge.s32.totalorder %s377_s15, 1  ;;  %s377_s15 = sphi %s404_s15, %s14_s15  }
   0x2   : > { %p161_p1 = scmp.lt.s32.totalorder %s377_s15, 3 }
   0x4   : > { %p162_p2 = pnand %p326_p0, %p161_p1 }
   0x5   : > { %p185_p3 = scmp.lt.s32.totalorder (!%p162_p2), %s322_s16, 1 }
   0x6   : > { %165 = sbr.rel (%p162_p2) target bundleno = 169 (0xa9), region = 36 }
   0xb   : > { %v361_v0 = vld [vmem:[%s447_s2 + $0x28] sm:$0xff]  ;;  %v360_v1 = vld [vmem:[%s447_s2 + $0x20] sm:$0xff]  ;;  %v359_v2 = vld [vmem:[%s447_s2 + $0x18] sm:$0xff]  ;;  %s451_s16 = smov (!%p185_p3, %s322_s16), 1  ;;  %vm247_vm0 = vcmask 785408   ;;  %vm267_vm1 = vcmask 256000  }
   0xc   : > { %253 = vmatpush.bf16.msra.mxu0 %v361_v0  ;;  %v358_v3 = vld [vmem:[%s447_s2 + $0x10] sm:$0xff]  ;;  %v357_v4 = vld [vmem:[%s447_s2 + $0x8] sm:$0xff]  ;;  %s327_s27 = sshll.u32 %s451_s16, 1  ;;  %v356_v5 = vld [vmem:[%s447_s2] sm:$0xff]  ;;  %s328_s9 = sshll.u32 %s451_s16, 2 }
   0xd   : > { %s188_s6 = scalar_lea.vmem %s445_s0, %s327_s27  ;;  %v370_v7 = vld [vmem:[%s448_s3] ss:$0 sm:$0xff]  ;;  %s192_s14 = scalar_lea.vmem %s449_s4, %s328_s9 }
   0xe   : > { %v194_v6 = vld [vmem:[%s188_s6] sm:$0x3] }
   0xf   : > { %v265_v10 = vld [vmem:[%s446_s1] sm:$0x7] }
  0x10   : > { %254 = vmatpush.bf16.msra.mxu0 %v360_v1 }
  0x14   : > { %255 = vmatpush.bf16.msra.mxu0 %v359_v2 }
  0x18   : > { %256 = vmatpush.bf16.msra.mxu0 %v358_v3 }
  0x1c   : > { %257 = vmatpush.bf16.msra.mxu0 %v357_v4 }
  0x20   : > { %258 = vmatpush.bf16.msra.mxu0 %v356_v5 }
  0x23   : > { %353 = vmatmul.msk.bf16.vlgmr.msra.gmra.mxu0 %vm247_vm0, %v194_v6 }
  0xa0   : > { %v260_v8 = vpop.f32.mrf.mxu0 }
  0xa1   : > { %v261_v9 = vadd.f32 %v370_v7, %v260_v8 }
  0xa3   : > { %v264_v11 = vmul.f32 5.656854, %v261_v9 }
  0xa5   : > { %v266_v12 = vadd.f32 %v265_v10, %v264_v11 }
  0xa7   : > { %268 = vst.msk [vmem:[%s192_s14] sm:$0x7] %vm267_vm1, %v266_v12 }
  0xa8   : > { %v262_v13 = vpop.f32.mrf.mxu0 }
  0xa9 PF: > { %s14_s15 = sadd.s32 1, %s377_s15  }
  0xaa   : > { %p11_p4 = scmp.ge.s32.totalorder %s14_s15, 4  }
  0xac   :  { %13 = sbr.rel (!%p11_p4) target bundleno = 1 (0x1), region = 66 }

// kernel: encoder_forward.9
= control target key start
LH: loop header
LB: loop body
LE: loop exit
PB: predicated region body
PF: predicated region fallthrough
CT: control target
= control target key end

     0   :  { %vm24_vm0 = vcmask 261120   ;;  %v125_v2 = vmov 32.0   ;;  %vm100_vm5 = vcmask 781312   ;;  %s180_s0 = inlined_call_operand.vmem [shape: f32[8,32], index: 0, kind: input, shape index: {}]   ;;  %s181_s1 = inlined_call_operand.vmem [shape: f32[1,32], index: 1, kind: input, shape index: {}]   ;;  %s182_s2 = inlined_call_operand.vmem [shape: f32[1,32], index: 2, kind: input, shape index: {}]   ;;  %s183_s4 = inlined_call_operand.vmem [shape: f32[1,96], index: 4, kind: input, shape index: {}]   ;;  %s184_s3 = inlined_call_operand.vmem [shape: bf16[32,96], index: 3, kind: input, shape index: {}]   ;;  %s185_s5 = inlined_call_operand.vmem [shape: bf16[8,96], index: 5, kind: output, shape index: {}]  }
   0x1   :  { %v21_v0 = vld [vmem:[%s180_s0] sm:$0xff]  ;;  %121 = vrcp.f32 %v125_v2  ;;  %v116_v14 = vld [vmem:[%s184_s3 + $0x8] sm:$0xff] }
   0x2   :  { %v25_v1 = vsel %vm24_vm0, %v21_v0, 0.0  ;;  %92 = vmatpush.bf16.msra.mxu0 %v116_v14  ;;  %v115_v15 = vld [vmem:[%s184_s3] sm:$0xff] }
   0x3   :  { %26 = vadd.xlane.f32.xlu0 %v25_v1  ;;  %v118_v25 = vld [vmem:[%s181_s1] ss:$0 sm:$0xff] }
   0x4   :  { %v119_v28 = vld [vmem:[%s182_s2] ss:$0 sm:$0xff] }
   0x5   :  { %v120_v32 = vld [vmem:[%s183_s4] ss:$0 sm:$0xff] }
   0x6   :  { %93 = vmatpush.bf16.msra.mxu0 %v115_v15 }
   0x7   :  { %v122_v3 = vpop.eup %121 }
   0x8   :  { %v29_v4 = vmul.f32 32.0, %v122_v3  ;;  %vm33_vm1 = vweird.f32 %v122_v3 }
   0xa   :  { %v30_v5 = vsub.f32 1.0, %v29_v4 }
   0xc   :  { %v31_v6 = vmul.f32 %v122_v3, %v30_v5 }
   0xe   :  { %v32_v7 = vadd.f32 %v122_v3, %v31_v6 }
  0x10   :  { %v34_v8 = vsel %vm33_vm1, %v122_v3, %v32_v7 }
  0x76   :  { %v27_v9 = vpop.xlane.xlu0 %26 }
  0x77   :  { %v35_v10 = vmul.f32 %v34_v8, %v27_v9 }
  0x79   :  { %v36_v11 = vsub.f32 %v21_v0, %v35_v10 }
  0x7b   :  { %v37_v12 = vmul.f32 %v36_v11, %v36_v11 }
  0x7d   :  { %v38_v13 = vsel %vm24_vm0, %v37_v12, 0.0 }
  0x7e   :  { %39 = vadd.xlane.f32.xlu0 %v38_v13 }
  0xf1   :  { %v40_v16 = vpop.xlane.xlu0 %39 }
  0xf2   :  { %v41_v17 = vmul.f32 %v40_v16, %v34_v8 }
  0xf4   :  { %v42_v18 = vadd.f32 1e-12, %v41_v17 }
  0xf6   :  { %123 = vrsqrt.f32 %v42_v18  ;;  %vm49_vm3 = vweird.f32 %v42_v18 }
  0xfc   :  { %v124_v19 = vpop.eup %123 }
  0xfd   :  { %v44_v20 = vmul.f32 %v124_v19, %v42_v18  ;;  %vm50_vm2 = vweird.f32 %v124_v19 }
  0xfe   :  { %vm51_vm4 = vmor %vm49_vm3, %vm50_vm2 }
  0xff   :  { %v45_v21 = vmul.f32 %v124_v19, %v44_v20 }
 0x101   :  { %v46_v22 = vmul.f32 0.5, %v45_v21 }
 0x103   :  { %v47_v23 = vsub.f32 1.5, %v46_v22 }
 0x105   :  { %v48_v24 = vmul.f32 %v124_v19, %v47_v23 }
 0x107   :  { %v52_v26 = vsel %vm51_vm4, %v124_v19, %v48_v24 }
 0x108   :  { %v53_v27 = vmul.f32 %v52_v26, %v36_v11 }
 0x10a   :  { %v57_v29 = vmul.f32 %v118_v25, %v53_v27 }
 0x10c   :  { %v61_v30 = vadd.f32 %v119_v28, %v57_v29 }
 0x10e   :  { %v62_v31 = vpack.c.bf16 %v61_v30, %v61_v30 }
 0x110   :  { %114 = vmatmul.msk.bf16.vlgmr.msra.gmra.mxu0 %vm24_vm0, %v62_v31 }
 0x18d   :  { %v95_v33 = vpop.f32.mrf.mxu0 }
 0x18e   :  { %v96_v34 = vadd.f32 %v120_v32, %v95_v33 }
 0x190   :  { %v99_v35 = vpack.c.bf16 %v96_v34, %v96_v34 }
 0x192   :  { %101 = vst.msk [vmem:[%s185_s5] sm:$0xf] %vm100_vm5, %v99_v35 }
 0x195   :  { %v97_v36 = vpop.f32.mrf.mxu0 }

// kernel: encoder_forward.15
= control target key start
LH: loop header
LB: loop body
LE: loop exit
PB: predicated region body
PF: predicated region fallthrough
CT: control target
= control target key end

     0   :  { %vm17_vm0 = vcmask 261120   ;;  %v67_v2 = vmov 32.0   ;;  %s103_s0 = inlined_call_operand.vmem [shape: f32[8,32], index: 0, kind: input, shape index: {}]   ;;  %s104_s1 = inlined_call_operand.vmem [shape: f32[1,32], index: 1, kind: input, shape index: {}]   ;;  %s105_s2 = inlined_call_operand.vmem [shape: f32[1,32], index: 2, kind: input, shape index: {}]   ;;  %s106_s3 = inlined_call_operand.vmem [shape: f32[8,32], index: 3, kind: output, shape index: {}]  }
   0x1   :  { %v14_v0 = vld [vmem:[%s103_s0] sm:$0xff]  ;;  %63 = vrcp.f32 %v67_v2 }
   0x2   :  { %v18_v1 = vsel %vm17_vm0, %v14_v0, 0.0  ;;  %v61_v23 = vld [vmem:[%s104_s1] ss:$0 sm:$0xff] }
   0x3   :  { %19 = vadd.xlane.f32.xlu0 %v18_v1  ;;  %v62_v25 = vld [vmem:[%s105_s2] ss:$0 sm:$0xff] }
   0x7   :  { %v64_v3 = vpop.eup %63 }
   0x8   :  { %v22_v4 = vmul.f32 32.0, %v64_v3  ;;  %vm26_vm1 = vweird.f32 %v64_v3 }
   0xa   :  { %v23_v5 = vsub.f32 1.0, %v22_v4 }
   0xc   :  { %v24_v6 = vmul.f32 %v64_v3, %v23_v5 }
   0xe   :  { %v25_v7 = vadd.f32 %v64_v3, %v24_v6 }
  0x10   :  { %v27_v8 = vsel %vm26_vm1, %v64_v3, %v25_v7 }
  0x76   :  { %v20_v9 = vpop.xlane.xlu0 %19 }
  0x77   :  { %v28_v10 = vmul.f32 %v27_v8, %v20_v9 }
  0x79   :  { %v29_v11 = vsub.f32 %v14_v0, %v28_v10 }
  0x7b   :  { %v30_v12 = vmul.f32 %v29_v11, %v29_v11 }
  0x7d   :  { %v31_v13 = vsel %vm17_vm0, %v30_v12, 0.0 }
  0x7e   :  { %32 = vadd.xlane.f32.xlu0 %v31_v13 }
  0xf1   :  { %v33_v14 = vpop.xlane.xlu0 %32 }
  0xf2   :  { %v34_v15 = vmul.f32 %v33_v14, %v27_v8 }
  0xf4   :  { %v35_v16 = vadd.f32 1e-12, %v34_v15 }
  0xf6   :  { %65 = vrsqrt.f32 %v35_v16  ;;  %vm42_vm3 = vweird.f32 %v35_v16 }
  0xfc   :  { %v66_v17 = vpop.eup %65 }
  0xfd   :  { %v37_v18 = vmul.f32 %v66_v17, %v35_v16  ;;  %vm43_vm2 = vweird.f32 %v66_v17 }
  0xfe   :  { %vm44_vm4 = vmor %vm42_vm3, %vm43_vm2 }
  0xff   :  { %v38_v19 = vmul.f32 %v66_v17, %v37_v18 }
 0x101   :  { %v39_v20 = vmul.f32 0.5, %v38_v19 }
 0x103   :  { %v40_v21 = vsub.f32 1.5, %v39_v20 }
 0x105   :  { %v41_v22 = vmul.f32 %v66_v17, %v40_v21 }
 0x107   :  { %v45_v24 = vsel %vm44_vm4, %v66_v17, %v41_v22 }
 0x108   :  { %v46_v26 = vmul.f32 %v45_v24, %v29_v11 }
 0x10a   :  { %v50_v27 = vmul.f32 %v61_v23, %v46_v26 }
 0x10c   :  { %v54_v28 = vadd.f32 %v62_v25, %v50_v27 }
 0x10e   :  { %55 = vst.msk [vmem:[%s106_s3] sm:$0xff] %vm17_vm0, %v54_v28 }

// kernel: encoder_forward.10
= control target key start
LH: loop header
LB: loop body
LE: loop exit
PB: predicated region body
PF: predicated region fallthrough
CT: control target
= control target key end

     0   :  { %s642_s15 = smov 0   ;;  %s644_s16 = smov 0   ;;  %s716_s0 = inlined_call_operand.vmem [shape: bf16[2,4,3,8], index: 0, kind: input, shape index: {}]   ;;  %s717_s1 = inlined_call_operand.vmem [shape: bf16[2,4,3,8], index: 1, kind: input, shape index: {}]   ;;  %s718_s2 = inlined_call_operand.vmem [shape: bf16[2,4,3,8], index: 2, kind: input, shape index: {}]   ;;  %s719_s3 = inlined_call_operand.vmem [shape: f32[2,1,3], index: 3, kind: input, shape index: {}]   ;;  %s720_s4 = inlined_call_operand.vmem [shape: bf16[2,4,3,8], index: 4, kind: output, shape index: {}]  }
   0x1   :  { %s646_s17 = smov 0   ;;  %s648_s18 = smov 0  }
   0x2   :  { %s650_s19 = smov 0  }
   0x3 LB: > { %s23_s20 = sadd.s32 1, %s605_s17  ;;  %s26_s21 = sadd.s32 1, %s609_s18  ;;  %s613_s19 = sphi %s650_s19, %s14_s19   ;;  %s609_s18 = sphi %s648_s18, %s726_s18   ;;  %s605_s17 = sphi %s646_s17, %s725_s17   ;;  %s601_s16 = sphi %s644_s16, %s724_s16   ;;  %s597_s15 = sphi %s642_s15, %s723_s15  }
   0x4   : > { %p24_p0 = scmp.ge.s32.totalorder %s23_s20, 4  ;;  %p516_p1 = scmp.ge.s32.totalorder %s613_s19, 1 }
   0x5   : > { %p219_p2 = scmp.lt.s32.totalorder %s613_s19, 9 }
   0x6   : > { %s728_s20 = smov (%p24_p0, %s23_s20), 0  ;;  %s730_s21 = smov (!%p24_p0, %s26_s21), %s609_s18 }
   0x7   : > { %p220_p3 = pnand %p516_p1, %p219_p2  ;;  %p28_p4 = scmp.ge.s32.totalorder %s730_s21, 2 }
   0x8   : > { %p270_p5 = scmp.lt.s32.totalorder (!%p220_p3), %s601_s16, 1  ;;  %p272_p6 = scmp.lt.s32.totalorder (!%p220_p3), %s597_s15, 3 }
   0x9   : > { %s732_s21 = smov (%p28_p4, %s730_s21), 0  ;;  %223 = sbr.rel (%p220_p3) target bundleno = 548 (0x224), region = 36 }
   0xe   : > { %s734_s16 = smov (!%p270_p5, %s601_s16), 1  ;;  %s736_s15 = smov (!%p272_p6, %s597_s15), 3  ;;  %vm311_vm0 = vcmask 64512   ;;  %v615_v4 = vmov 0   ;;  %vm336_vm3 = vcmask 18432   ;;  %vm354_vm4 = vcmask 1040384  }
   0xf   : > { %s517_s22 = sshll.u32 %s734_s16, 2  ;;  %s296_s7 = scalar_lea.vmem %s719_s3, %s734_s16  ;;  %vm355_vm5 = vcmask 1041408   ;;  %v616_v19 = vmov 65535   ;;  %vm350_vm6 = vcmask 23552   ;;  %vm375_vm7 = vcmask 58368  }
  0x10   : > { %s275_s23 = sadd.s32 %s517_s22, %s736_s15  ;;  %v309_v3 = vld [vmem:[%s296_s7] sm:$0x1]  ;;  %v356_v20 = vsel %vm354_vm4, 4294967295, %v616_v19  ;;  %vm376_vm8 = vsmask.f32 1280 }
  0x11   : > { %s672_s24 = sshll.u32 %s275_s23, 1  ;;  %vm310_vm1 = vcmp.ne.f32.partialorder %v309_v3, 0.0  ;;  %v357_v21 = vsel %vm355_vm5, %v356_v20, 0  ;;  %vm377_vm9 = vmand %vm375_vm7, %vm376_vm8 }
  0x12   : > { %s285_s27 = scalar_lea.vmem %s717_s1, %s672_s24  ;;  %s277_s30 = scalar_lea.vmem %s716_s0, %s672_s24  ;;  %v332_v5 = vsel %vm310_vm1, 1, %v615_v4 }
  0x13   : > { %v307_v0 = vld [vmem:[%s285_s27] sm:$0x3]  ;;  %v333_v6 = vperm.slane %v332_v5, 0  ;;  %s293_s10 = scalar_lea.vmem %s718_s2, %s672_s24  ;;  %s304_s13 = scalar_lea.vmem %s720_s4, %s672_s24 }
  0x14   : > { %v316_v1 = vsel %vm311_vm0, %v307_v0, 0  ;;  %v306_v2 = vld [vmem:[%s277_s30] sm:$0x3] }
  0x15   : > { %325 = vmatpush.bf16.xpose.msra.mxu0 %v316_v1  ;;  %vm685_vm2 = vcmp.eq.s32.totalorder %v333_v6, 1  ;;  %v308_v18 = vld [vmem:[%s293_s10] sm:$0x3] }
  0x16   : > { %v359_v22 = vand.u32 %v357_v21, %v308_v18  ;;  %v378_v29 = vld [vmem:[%s304_s13] sm:$0x3] }
  0x18   : > { %368 = vmatpush.bf16.msra.mxu1 %v359_v22 }
  0x1c   : > { %525 = vmatmul.msk.bf16.vlgmr.msra.gmra.mxu0 %vm311_vm0, %v306_v2 }
  0x99   : > { %v327_v7 = vpop.f32.mrf.mxu0 }
  0x9a   : > { %v331_v9 = vmul.f32 0.35355338, %v327_v7 }
  0x9c   : > { %v335_v10 = vsel %vm685_vm2, %v331_v9, -3.4028235e+38 }
  0x9d   : > { %v337_v11 = vsel %vm336_vm3, %v335_v10, -inf }
  0x9e   : > { %338 = vmax.xlane.f32.xlu0 %v337_v11 }
  0xa1   : > { %v329_v12 = vpop.f32.mrf.mxu0 }
 0x111   : > { %v339_v13 = vpop.xlane.xlu0 %338 }
 0x112   : > { %v340_v14 = vsub.f32 %v335_v10, %v339_v13 }
 0x114   : > { %v341_v15 = vmul.f32 1.442695, %v340_v14 }
 0x116   : > { %571 = vpow2.f32 %v341_v15 }
 0x11c   : > { %v572_v16 = vpop.eup %571 }
 0x11d   : > { %v343_v17 = vsel %vm336_vm3, %v572_v16, 0.0 }
 0x11e   : > { %344 = vadd.xlane.f32.xlu0 %v343_v17 }
 0x191   : > { %v345_v23 = vpop.xlane.xlu0 %344 }
 0x192   : > { %573 = vrcp.f32 %v345_v23 }
 0x198   : > { %v574_v24 = vpop.eup %573 }
 0x199   : > { %v347_v25 = vmul.f32 %v574_v24, %v572_v16 }
 0x19b   : > { %v348_v26 = vsel %vm685_vm2, %v347_v25, 0.0 }
 0x19c   : > { %v349_v27 = vpack.c.bf16 %v348_v26, %v348_v26 }
 0x19e   : > { %526 = vmatmul.msk.bf16.vlgmr.msra.gmra.mxu1 %vm350_vm6, %v349_v27 }
 0x21b   : > { %v370_v28 = vpop.f32.mrf.mxu1 }
 0x21c   : > { %v374_v30 = vpack.c.bf16 %v370_v28, %v370_v28 }
 0x21e   : > { %v379_v31 = vsel %vm377_vm9, %v374_v30, %v378_v29 }
 0x21f   : > { %380 = vst [vmem:[%s304_s13] sm:$0x3] %v379_v31 }
 0x223   : > { %v372_v32 = vpop.f32.mrf.mxu1 }
 0x224 PF: > { %s14_s19 = sadd.s32 1, %s613_s19   ;;  %s723_s15 = smov %s605_s17 }
 0x225   : > { %p11_p7 = scmp.ge.s32.totalorder %s14_s19, 10   ;;  %s724_s16 = smov %s609_s18 }
 0x226   : > { %s725_s17 = smov %s728_s20  ;;  %s726_s18 = smov %s732_s21 }
 0x227   :  { %13 = sbr.rel (!%p11_p7) target bundleno = 3 (0x3), region = 75 }

// kernel: encoder_forward.11
= control target key start
LH: loop header
LB: loop body
LE: loop exit
PB: predicated region body
PF: predicated region fallthrough
CT: control target
= control target key end

     0   :  { %vm57_vm0 = vcmask 261120   ;;  %v267_v10 = vmov 32.0   ;;  %vm186_vm5 = vcmask 523264   ;;  %s381_s2 = inlined_call_operand.vmem [shape: bf16[32,32], index: 2, kind: input, shape index: {}]   ;;  %s382_s3 = inlined_call_operand.vmem [shape: f32[1,32], index: 3, kind: input, shape index: {}]   ;;  %s383_s0 = inlined_call_operand.vmem [shape: bf16[8,32], index: 0, kind: input, shape index: {}]   ;;  %s384_s1 = inlined_call_operand.vmem [shape: f32[8,32], index: 1, kind: input, shape index: {}]   ;;  %s385_s4 = inlined_call_operand.vmem [shape: f32[1,32], index: 4, kind: input, shape index: {}]   ;;  %s386_s5 = inlined_call_operand.vmem [shape: f32[1,32], index: 5, kind: input, shape index: {}]   ;;  %s387_s7 = inlined_call_operand.vmem [shape: f32[1,64], index: 7, kind: input, shape index: {}]   ;;  %s388_s6 = inlined_call_operand.vmem [shape: bf16[32,64], index: 6, kind: input, shape index: {}]   ;;  %s389_s8 = inlined_call_operand.vmem [shape: bf16[64,32], index: 8, kind: input, shape index: {}]   ;;  %s390_s9 = inlined_call_operand.vmem [shape: f32[1,32], index: 9, kind: input, shape index: {}]   ;;  %s391_s10 = inlined_call_operand.vmem [shape: f32[8,32], index: 10, kind: output, shape index: {}]  }
   0x1   :  { %v250_v0 = vld [vmem:[%s381_s2 + $0x8] sm:$0xff]  ;;  %v249_v1 = vld [vmem:[%s381_s2] sm:$0xff]  ;;  %263 = vrcp.f32 %v267_v10  ;;  %v256_v24 = vld [vmem:[%s389_s8 + $0x18] sm:$0xff] }
   0x2   :  { %67 = vmatpush.bf16.msra.mxu0 %v250_v0  ;;  %v36_v2 = vld [vmem:[%s383_s0] sm:$0xf]  ;;  %v252_v22 = vld [vmem:[%s388_s6 + $0x8] sm:$0xff]  ;;  %194 = vmatpush.bf16.msra.mxu2 %v256_v24  ;;  %v255_v27 = vld [vmem:[%s389_s8 + $0x10] sm:$0xff] }
   0x3   :  { %v258_v3 = vld [vmem:[%s382_s3] ss:$0 sm:$0xff]  ;;  %145 = vmatpush.bf16.msra.mxu1 %v252_v22  ;;  %v254_v42 = vld [vmem:[%s389_s8 + $0x8] sm:$0xff] }
   0x4   :  { %v74_v5 = vld [vmem:[%s384_s1] sm:$0xff] }
   0x5   :  { %v251_v23 = vld [vmem:[%s388_s6] sm:$0xff] }
   0x6   :  { %68 = vmatpush.bf16.msra.mxu0 %v249_v1  ;;  %195 = vmatpush.bf16.msra.mxu2 %v255_v27  ;;  %v259_v35 = vld [vmem:[%s385_s4] ss:$0 sm:$0xff] }
   0x7   :  { %v264_v11 = vpop.eup %263  ;;  %146 = vmatpush.bf16.msra.mxu1 %v251_v23  ;;  %v260_v38 = vld [vmem:[%s386_s5] ss:$0 sm:$0xff] }
   0x8   :  { %v82_v12 = vmul.f32 32.0, %v264_v11  ;;  %vm86_vm1 = vweird.f32 %v264_v11  ;;  %v253_v43 = vld [vmem:[%s389_s8] sm:$0xff] }
   0x9   :  { %222 = vmatmul.msk.bf16.vlgmr.msra.gmra.mxu0 %vm57_vm0, %v36_v2  ;;  %v261_v44 = vld [vmem:[%s387_s7] ss:$0 sm:$0xff] }
   0xa   :  { %v83_v13 = vsub.f32 1.0, %v82_v12  ;;  %196 = vmatpush.bf16.msra.mxu2 %v254_v42  ;;  %v262_v50 = vld [vmem:[%s390_s9] ss:$0 sm:$0xff] }
   0xc   :  { %v84_v14 = vmul.f32 %v264_v11, %v83_v13 }
   0xe   :  { %v85_v15 = vadd.f32 %v264_v11, %v84_v14  ;;  %197 = vmatpush.bf16.msra.mxu2 %v253_v43 }
  0x10   :  { %v87_v16 = vsel %vm86_vm1, %v264_v11, %v85_v15 }
  0x86   :  { %v70_v4 = vpop.f32.mrf.mxu0 }
  0x87   :  { %v71_v6 = vadd.f32 %v258_v3, %v70_v4 }
  0x89   :  { %v339_v7 = vadd.f32 %v74_v5, %v71_v6 }
  0x8b   :  { %v78_v8 = vsel %vm57_vm0, %v339_v7, 0.0 }
  0x8c   :  { %79 = vadd.xlane.f32.xlu0 %v78_v8 }
  0x8e   :  { %v72_v9 = vpop.f32.mrf.mxu0 }
  0xff   :  { %v80_v17 = vpop.xlane.xlu0 %79 }
 0x100   :  { %v88_v18 = vmul.f32 %v87_v16, %v80_v17 }
 0x102   :  { %v89_v19 = vsub.f32 %v339_v7, %v88_v18 }
 0x104   :  { %v90_v20 = vmul.f32 %v89_v19, %v89_v19 }
 0x106   :  { %v91_v21 = vsel %vm57_vm0, %v90_v20, 0.0 }
 0x107   :  { %92 = vadd.xlane.f32.xlu0 %v91_v21 }
 0x17a   :  { %v93_v25 = vpop.xlane.xlu0 %92 }
 0x17b   :  { %v94_v26 = vmul.f32 %v93_v25, %v87_v16 }
 0x17d   :  { %v95_v28 = vadd.f32 1e-12, %v94_v26 }
 0x17f   :  { %265 = vrsqrt.f32 %v95_v28  ;;  %vm102_vm3 = vweird.f32 %v95_v28 }
 0x185   :  { %v266_v29 = vpop.eup %265 }
 0x186   :  { %v97_v30 = vmul.f32 %v266_v29, %v95_v28  ;;  %vm103_vm2 = vweird.f32 %v266_v29 }
 0x187   :  { %vm104_vm4 = vmor %vm102_vm3, %vm103_vm2 }
 0x188   :  { %v98_v31 = vmul.f32 %v266_v29, %v97_v30 }
 0x18a   :  { %v99_v32 = vmul.f32 0.5, %v98_v31 }
 0x18c   :  { %v100_v33 = vsub.f32 1.5, %v99_v32 }
 0x18e   :  { %v101_v34 = vmul.f32 %v266_v29, %v100_v33 }
 0x190   :  { %v105_v36 = vsel %vm104_vm4, %v266_v29, %v101_v34 }
 0x191   :  { %v106_v37 = vmul.f32 %v105_v36, %v89_v19 }
 0x193   :  { %v110_v39 = vmul.f32 %v259_v35, %v106_v37 }
 0x195   :  { %v114_v40 = vadd.f32 %v260_v38, %v110_v39 }
 0x197   :  { %v115_v41 = vpack.c.bf16 %v114_v40, %v114_v40 }
 0x199   :  { %231 = vmatmul.msk.bf16.vlgmr.msra.gmra.mxu1 %vm57_vm0, %v115_v41 }
 0x216   :  { %v148_v45 = vpop.f32.mrf.mxu1 }
 0x217   :  { %v149_v46 = vadd.f32 %v261_v44, %v148_v45 }
 0x219   :  { %v152_v47 = vmax.f32 %v149_v46, 0.0 }
 0x21b   :  { %v153_v48 = vpack.c.bf16 %v152_v47, %v152_v47 }
 0x21d   :  { %248 = vmatmul.msk.bf16.vlgmr.msra.gmra.mxu2 %vm186_vm5, %v153_v48 }
 0x21e   :  { %v150_v49 = vpop.f32.mrf.mxu1 }
 0x2a0   :  { %v199_v51 = vpop.f32.mrf.mxu2 }
 0x2a1   :  { %v203_v52 = vadd.f32 %v199_v51, %v339_v7 }
 0x2a3   :  { %v208_v53 = vadd.f32 %v262_v50, %v203_v52 }
 0x2a5   :  { %209 = vst.msk [vmem:[%s391_s10] sm:$0xff] %vm57_vm0, %v208_v53 }
 0x2a8   :  { %v201_v54 = vpop.f32.mrf.mxu2 }

</bundles_post_ra>
